<compile_context>
chip_gen: v6e
topology: v6e:2x2x1
jax: 0.10.0
libtpu: 0.0.40
codegen_flags: <defaults>
</compile_context>

<pallas_src>
import functools

import jax
import jax.numpy as jnp
from jax.experimental import pallas as pl
from jax.experimental.pallas import tpu as pltpu


# ---------------------------------------------------------------------------
# Fused kernel: conv3x3+LeakyReLU+BN -> conv3x3+BN+ReLU -> conv3x3+BN+Sigmoid
#               -> out = fuse * att + curr      (one batch element per grid step)
# ---------------------------------------------------------------------------
def _fusion_kernel(curr_ref, prev_ref, w1c_ref, w1p_ref, w2_ref, w3_ref, aff_ref,
                   o_ref, xa_ref, xb_ref, *, H, W, pad):
    HW = H * W

    # Column-validity masks for horizontal taps (vertical out-of-range taps read
    # the zeroed halo region of the scratch instead).
    col = jax.lax.broadcasted_iota(jnp.int32, (1, HW), 1) % W
    mask_l = (col >= 1).astype(jnp.float32)       # tap at dw=-1 needs w-1 >= 0
    mask_r = (col <= W - 2).astype(jnp.float32)   # tap at dw=+1 needs w+1 <= W-1

    def conv3x3(x_ref, w_ref):
        # x_ref: (Cin, L) halo-extended flattened image; x_ref[c, pad + h*W + w]
        #        holds pixel (h, w); everything outside [pad, pad+HW) is zero.
        # w_ref: (9, Cout, Cin) per-tap weight matrices (tap k = dh*3 + dw).
        acc = None
        k = 0
        for oh in (-1, 0, 1):
            for ow in (-1, 0, 1):
                start = pad + oh * W + ow
                t = x_ref[:, start:start + HW]        # (Cin, HW) shifted window
                if ow == -1:
                    t = t * mask_l
                elif ow == 1:
                    t = t * mask_r
                d = jnp.dot(w_ref[k], t, preferred_element_type=jnp.float32)
                acc = d if acc is None else acc + d
                k += 1
        return acc                                    # (Cout, HW) float32

    # Zero the halo scratches; the data window [pad, pad+HW) is rewritten per
    # stage, the halos stay zero and implement the conv's "same" padding.
    xa_ref[...] = jnp.zeros_like(xa_ref)
    xb_ref[...] = jnp.zeros_like(xb_ref)

    curr = curr_ref[0]                                # (Cc, HW)
    xa_ref[:, pad:pad + HW] = curr
    xb_ref[:, pad:pad + HW] = prev_ref[0]

    # Stage 1: fuse_conv = Conv(cat(curr, prev)) -> LeakyReLU(0.01) -> BatchNorm.
    # Channel-concat is expressed as contracting curr/prev against the two halves
    # of the conv weight (no concatenated tensor is ever materialized).
    b1 = aff_ref[:, 0:1]
    s1 = aff_ref[:, 1:2]
    t1 = aff_ref[:, 2:3]
    y = conv3x3(xa_ref, w1c_ref) + conv3x3(xb_ref, w1p_ref) + b1
    y = jnp.where(y >= 0, y, 0.01 * y)                # PyTorch LeakyReLU default slope
    fuse = y * s1 + t1                                # (Cc, HW) -- stays on chip

    # Stage 2: Conv -> BatchNorm (conv bias pre-folded into t2) -> ReLU.
    xa_ref[:, pad:pad + HW] = fuse
    s2 = aff_ref[:, 3:4]
    t2 = aff_ref[:, 4:5]
    hidden = jnp.maximum(conv3x3(xa_ref, w2_ref) * s2 + t2, 0.0)

    # Stage 3: Conv -> BatchNorm (bias folded) -> Sigmoid, then residual combine.
    xa_ref[:, pad:pad + HW] = hidden
    s3 = aff_ref[:, 5:6]
    t3 = aff_ref[:, 6:7]
    att = jax.nn.sigmoid(conv3x3(xa_ref, w3_ref) * s3 + t3)

    o_ref[0] = (fuse * att + curr).astype(o_ref.dtype)


# ---------------------------------------------------------------------------
# Wrapper: takes / returns PyTorch-native NCHW (free reshape to (N, C, H*W)).
# ---------------------------------------------------------------------------
def residual_fusion_block(curr, prev, kp):
    """curr: (N, Cc, H, W), prev: (N, Cp, H, W). Returns (N, Cc, H, W)."""
    N, Cc, H, W = curr.shape
    Cp = prev.shape[1]
    HW = H * W
    pad = pl.cdiv(W + 1, 128) * 128                   # lane-aligned halo >= W + 1
    L = HW + 2 * pad

    curr2 = curr.reshape(N, Cc, HW)                   # free reshapes: spatial -> lanes
    prev2 = prev.reshape(N, Cp, HW)

    kernel = functools.partial(_fusion_kernel, H=H, W=W, pad=pad)

    out2 = pl.pallas_call(
        kernel,
        grid=(N,),
        in_specs=[
            pl.BlockSpec((1, Cc, HW), lambda n: (n, 0, 0)),     # curr
            pl.BlockSpec((1, Cp, HW), lambda n: (n, 0, 0)),     # prev
            pl.BlockSpec((9, Cc, Cc), lambda n: (0, 0, 0)),     # w1, curr half
            pl.BlockSpec((9, Cc, Cp), lambda n: (0, 0, 0)),     # w1, prev half
            pl.BlockSpec((9, Cc, Cc), lambda n: (0, 0, 0)),     # w2
            pl.BlockSpec((9, Cc, Cc), lambda n: (0, 0, 0)),     # w3
            pl.BlockSpec((Cc, 7), lambda n: (0, 0)),            # packed bias / BN affine
        ],
        out_specs=pl.BlockSpec((1, Cc, HW), lambda n: (n, 0, 0)),
        out_shape=jax.ShapeDtypeStruct((N, Cc, HW), curr.dtype),
        scratch_shapes=[
            pltpu.VMEM((Cc, L), jnp.float32),    # halo buffer for curr / fuse / hidden
            pltpu.VMEM((Cp, L), jnp.float32),    # halo buffer for prev
        ],
        compiler_params=pltpu.CompilerParams(dimension_semantics=("parallel",)),
    )(curr2, prev2, kp["w1c"], kp["w1p"], kp["w2"], kp["w3"], kp["aff"])

    return out2.reshape(N, Cc, H, W)


# ---------------------------------------------------------------------------
# Deterministic synthetic parameters (PyTorch-equivalent form) + kernel prep
# ---------------------------------------------------------------------------
def init_params(key, curr_ch, prev_ch, eps=1e-5):
    keys = jax.random.split(key, 18)
    k = iter(keys)

    def conv_params(cin, cout):
        w = jax.random.normal(next(k), (3, 3, cin, cout), jnp.float32)
        w = w * (1.0 / jnp.sqrt(9.0 * cin))
        b = 0.1 * jax.random.normal(next(k), (cout,), jnp.float32)
        return w, b

    def bn_params(c):
        gamma = 1.0 + 0.1 * jax.random.normal(next(k), (c,), jnp.float32)
        beta = 0.1 * jax.random.normal(next(k), (c,), jnp.float32)
        mean = 0.1 * jax.random.normal(next(k), (c,), jnp.float32)
        var = jnp.abs(jax.random.normal(next(k), (c,), jnp.float32)) + 0.5
        scale = gamma / jnp.sqrt(var + eps)
        bias = beta - mean * scale
        return scale, bias

    p = {}
    p["w1"], p["b1"] = conv_params(curr_ch + prev_ch, curr_ch)
    p["s1"], p["t1"] = bn_params(curr_ch)
    p["w2"], p["b2"] = conv_params(curr_ch, curr_ch)
    p["s2"], p["t2"] = bn_params(curr_ch)
    p["w3"], p["b3"] = conv_params(curr_ch, curr_ch)
    p["s3"], p["t3"] = bn_params(curr_ch)
    return p


def prep_params(p, curr_ch):
    """Kernel-ready params: HWIO (3,3,Cin,Cout) -> per-tap (9,Cout,Cin) stacks
    (fuse conv split into curr/prev halves), conv bias folded into BN bias for the
    attention convs, and all per-channel vectors packed into one (Cc, 7) array."""
    def tap_stack(w):
        return jnp.transpose(w, (0, 1, 3, 2)).reshape(9, w.shape[3], w.shape[2])

    return {
        "w1c": tap_stack(p["w1"][:, :, :curr_ch, :]),
        "w1p": tap_stack(p["w1"][:, :, curr_ch:, :]),
        "w2": tap_stack(p["w2"]),
        "w3": tap_stack(p["w3"]),
        "aff": jnp.stack(
            [p["b1"], p["s1"], p["t1"],
             p["s2"], p["t2"] + p["b2"] * p["s2"],
             p["s3"], p["t3"] + p["b3"] * p["s3"]], axis=1),    # (Cc, 7)
    }


# ---------------------------------------------------------------------------
# Pure-JAX (XLA) reference in NCHW for numerical verification
# ---------------------------------------------------------------------------
def reference(curr, prev, p):
    def conv(x, w, b):
        y = jax.lax.conv_general_dilated(
            x, w, window_strides=(1, 1), padding="SAME",
            dimension_numbers=("NCHW", "HWIO", "NCHW"))
        return y + b.reshape(1, -1, 1, 1)

    def aff(x, s, t):
        return x * s.reshape(1, -1, 1, 1) + t.reshape(1, -1, 1, 1)

    cat = jnp.concatenate([curr, prev], axis=1)
    y = conv(cat, p["w1"], p["b1"])
    y = jnp.where(y >= 0, y, 0.01 * y)
    fuse = aff(y, p["s1"], p["t1"])
    h = jnp.maximum(aff(conv(fuse, p["w2"], p["b2"]), p["s2"], p["t2"]), 0.0)
    att = jax.nn.sigmoid(aff(conv(h, p["w3"], p["b3"]), p["s3"], p["t3"]))
    return fuse * att + curr


# ---------------------------------------------------------------------------
if __name__ == "__main__":
    N, Cc, Cp, H, W = 2, 4, 4, 16, 16

    key = jax.random.PRNGKey(0)
    k_curr, k_prev, k_param = jax.random.split(key, 3)

    # PyTorch-native NCHW inputs (no transposes needed anywhere).
    curr = jax.random.normal(k_curr, (N, Cc, H, W), jnp.float32)
    prev = jax.random.normal(k_prev, (N, Cp, H, W), jnp.float32)

    raw_params = init_params(k_param, Cc, Cp)
    kernel_params = prep_params(raw_params, Cc)

    out = residual_fusion_block(curr, prev, kernel_params)
    out = jax.block_until_ready(out)

    ref = reference(curr, prev, raw_params)
    assert out.shape == (N, Cc, H, W)
    max_err = float(jnp.max(jnp.abs(out - ref)))
    assert jnp.allclose(out, ref, atol=1e-3, rtol=1e-3), max_err

    print("KERNEL_OK")
</pallas_src>

<mosaic_0001>
module attributes {stable_mosaic.version = 11 : i64} {
  func.func @_fusion_kernel(%arg0: i32, %arg1: memref<1x4x256xf32, #tpu.memory_space<vmem>>, %arg2: memref<1x4x256xf32, #tpu.memory_space<vmem>>, %arg3: memref<9x4x4xf32, #tpu.memory_space<vmem>>, %arg4: memref<9x4x4xf32, #tpu.memory_space<vmem>>, %arg5: memref<9x4x4xf32, #tpu.memory_space<vmem>>, %arg6: memref<9x4x4xf32, #tpu.memory_space<vmem>>, %arg7: memref<4x7xf32, #tpu.memory_space<vmem>>, %arg8: memref<1x4x256xf32, #tpu.memory_space<vmem>>, %arg9: memref<4x512xf32, #tpu.memory_space<vmem>>, %arg10: memref<4x512xf32, #tpu.memory_space<vmem>>) attributes {dimension_semantics = [#tpu.dimension_semantics<parallel>], iteration_bounds = array<i64: 2>, scalar_prefetch = 0 : i64, scratch_operands = 2 : i64, tpu.core_type = #tpu.core_type<tc>, window_params = [{transform_indices = @transform_0, window_bounds = array<i64: 1, 4, 256>}, {transform_indices = @transform_1, window_bounds = array<i64: 1, 4, 256>}, {pipeline_mode = #tpu.pipeline_mode<synchronous>, transform_indices = @transform_2, window_bounds = array<i64: 9, 4, 4>}, {pipeline_mode = #tpu.pipeline_mode<synchronous>, transform_indices = @transform_3, window_bounds = array<i64: 9, 4, 4>}, {pipeline_mode = #tpu.pipeline_mode<synchronous>, transform_indices = @transform_4, window_bounds = array<i64: 9, 4, 4>}, {pipeline_mode = #tpu.pipeline_mode<synchronous>, transform_indices = @transform_5, window_bounds = array<i64: 9, 4, 4>}, {pipeline_mode = #tpu.pipeline_mode<synchronous>, transform_indices = @transform_6, window_bounds = array<i64: 4, 7>}, {transform_indices = @transform_7, window_bounds = array<i64: 1, 4, 256>}]} {
    %0 = tpu.iota {dimensions = array<i32: 1>} : vector<1x256xi32>
    %c16_i32 = arith.constant 16 : i32
    %c0_i32 = arith.constant 0 : i32
    %1 = arith.cmpi eq, %c16_i32, %c0_i32 : i32
    %c1_i32 = arith.constant 1 : i32
    %2 = arith.select %1, %c1_i32, %c16_i32 : i32
    %3 = vector.broadcast %2 : i32 to vector<1x256xi32>
    %4 = arith.remsi %0, %3 : vector<1x256xi32>
    %c0_i32_0 = arith.constant 0 : i32
    %5 = vector.broadcast %c0_i32_0 : i32 to vector<1x256xi32>
    %6 = arith.cmpi ne, %4, %5 : vector<1x256xi32>
    %c0_i32_1 = arith.constant 0 : i32
    %7 = vector.broadcast %c0_i32_1 : i32 to vector<1x256xi32>
    %8 = arith.cmpi slt, %4, %7 : vector<1x256xi32>
    %c0_i32_2 = arith.constant 0 : i32
    %9 = arith.cmpi slt, %2, %c0_i32_2 : i32
    %10 = vector.broadcast %9 : i1 to vector<1x256xi1>
    %11 = vector.broadcast %10 : vector<1x256xi1> to vector<1x256xi1>
    %12 = arith.xori %8, %11 : vector<1x256xi1>
    %13 = arith.andi %12, %6 : vector<1x256xi1>
    %14 = vector.broadcast %2 : i32 to vector<1x256xi32>
    %15 = arith.addi %4, %14 : vector<1x256xi32>
    %16 = arith.select %13, %15, %4 : vector<1x256xi1>, vector<1x256xi32>
    %c1_i32_3 = arith.constant 1 : i32
    %17 = vector.broadcast %c1_i32_3 : i32 to vector<1x256xi32>
    %18 = arith.cmpi sge, %16, %17 : vector<1x256xi32>
    %19 = arith.extui %18 : vector<1x256xi1> to vector<1x256xi32>
    %20 = arith.sitofp %19 : vector<1x256xi32> to vector<1x256xf32>
    %c14_i32 = arith.constant 14 : i32
    %21 = vector.broadcast %c14_i32 : i32 to vector<1x256xi32>
    %22 = arith.cmpi sle, %16, %21 : vector<1x256xi32>
    %23 = arith.extui %22 : vector<1x256xi1> to vector<1x256xi32>
    %24 = arith.sitofp %23 : vector<1x256xi32> to vector<1x256xf32>
    %cst = arith.constant 0.000000e+00 : f32
    %25 = vector.broadcast %cst : f32 to vector<4x512xf32>
    %c0 = arith.constant 0 : index
    %c0_4 = arith.constant 0 : index
    %26 = vector.load %arg9[%c0, %c0_4] : memref<4x512xf32, #tpu.memory_space<vmem>>, vector<4x512xf32>
    tpu.vector_store %arg9[%c0, %c0_4], %25 {strides = array<i32>} : memref<4x512xf32, #tpu.memory_space<vmem>>, vector<4x512xf32>,
    %cst_5 = arith.constant 0.000000e+00 : f32
    %27 = vector.broadcast %cst_5 : f32 to vector<4x512xf32>
    %c0_6 = arith.constant 0 : index
    %c0_7 = arith.constant 0 : index
    %28 = vector.load %arg10[%c0_6, %c0_7] : memref<4x512xf32, #tpu.memory_space<vmem>>, vector<4x512xf32>
    tpu.vector_store %arg10[%c0_6, %c0_7], %27 {strides = array<i32>} : memref<4x512xf32, #tpu.memory_space<vmem>>, vector<4x512xf32>,
    %c0_8 = arith.constant 0 : index
    %c0_9 = arith.constant 0 : index
    %c0_10 = arith.constant 0 : index
    %29 = vector.load %arg1[%c0_8, %c0_9, %c0_10] : memref<1x4x256xf32, #tpu.memory_space<vmem>>, vector<1x4x256xf32>
    %30 = vector.shape_cast %29 : vector<1x4x256xf32> to vector<4x256xf32>
    %c0_11 = arith.constant 0 : index
    %c128 = arith.constant 128 : index
    %31 = vector.load %arg9[%c0_11, %c128] : memref<4x512xf32, #tpu.memory_space<vmem>>, vector<4x256xf32>
    tpu.vector_store %arg9[%c0_11, %c128], %30 {strides = array<i32>} : memref<4x512xf32, #tpu.memory_space<vmem>>, vector<4x256xf32>,
    %c0_12 = arith.constant 0 : index
    %c0_13 = arith.constant 0 : index
    %c0_14 = arith.constant 0 : index
    %32 = vector.load %arg2[%c0_12, %c0_13, %c0_14] : memref<1x4x256xf32, #tpu.memory_space<vmem>>, vector<1x4x256xf32>
    %33 = vector.shape_cast %32 : vector<1x4x256xf32> to vector<4x256xf32>
    %c0_15 = arith.constant 0 : index
    %c128_16 = arith.constant 128 : index
    %34 = vector.load %arg10[%c0_15, %c128_16] : memref<4x512xf32, #tpu.memory_space<vmem>>, vector<4x256xf32>
    tpu.vector_store %arg10[%c0_15, %c128_16], %33 {strides = array<i32>} : memref<4x512xf32, #tpu.memory_space<vmem>>, vector<4x256xf32>,
    %c0_17 = arith.constant 0 : index
    %c0_18 = arith.constant 0 : index
    %35 = vector.load %arg7[%c0_17, %c0_18] : memref<4x7xf32, #tpu.memory_space<vmem>>, vector<4x1xf32>
    %c0_19 = arith.constant 0 : index
    %c1 = arith.constant 1 : index
    %36 = vector.load %arg7[%c0_19, %c1] : memref<4x7xf32, #tpu.memory_space<vmem>>, vector<4x1xf32>
    %c0_20 = arith.constant 0 : index
    %c2 = arith.constant 2 : index
    %37 = vector.load %arg7[%c0_20, %c2] : memref<4x7xf32, #tpu.memory_space<vmem>>, vector<4x1xf32>
    %c0_21 = arith.constant 0 : index
    %c111 = arith.constant 111 : index
    %38 = vector.load %arg9[%c0_21, %c111] : memref<4x512xf32, #tpu.memory_space<vmem>>, vector<4x256xf32>
    %39 = vector.broadcast %20 : vector<1x256xf32> to vector<4x256xf32>
    %40 = arith.mulf %38, %39 : vector<4x256xf32>
    %c0_22 = arith.constant 0 : index
    %c0_23 = arith.constant 0 : index
    %c0_24 = arith.constant 0 : index
    %41 = vector.load %arg3[%c0_22, %c0_23, %c0_24] : memref<9x4x4xf32, #tpu.memory_space<vmem>>, vector<1x4x4xf32>
    %42 = vector.shape_cast %41 : vector<1x4x4xf32> to vector<4x4xf32>
    %cst_25 = arith.constant dense<0.000000e+00> : vector<4x256xf32>
    %43 = tpu.matmul %42, %40, %cst_25 {dimension_numbers = #tpu.dot_dimension_numbers<[1], [0], [0], [1], [0, 0, 1, 1], [], []>} : vector<4x4xf32>, vector<4x256xf32>, vector<4x256xf32> -> vector<4x256xf32>
    %c0_26 = arith.constant 0 : index
    %c112 = arith.constant 112 : index
    %44 = vector.load %arg9[%c0_26, %c112] : memref<4x512xf32, #tpu.memory_space<vmem>>, vector<4x256xf32>
    %c1_27 = arith.constant 1 : index
    %c0_28 = arith.constant 0 : index
    %c0_29 = arith.constant 0 : index
    %45 = vector.load %arg3[%c1_27, %c0_28, %c0_29] : memref<9x4x4xf32, #tpu.memory_space<vmem>>, vector<1x4x4xf32>
    %46 = vector.shape_cast %45 : vector<1x4x4xf32> to vector<4x4xf32>
    %cst_30 = arith.constant dense<0.000000e+00> : vector<4x256xf32>
    %47 = tpu.matmul %46, %44, %cst_30 {dimension_numbers = #tpu.dot_dimension_numbers<[1], [0], [0], [1], [0, 0, 1, 1], [], []>} : vector<4x4xf32>, vector<4x256xf32>, vector<4x256xf32> -> vector<4x256xf32>
    %48 = arith.addf %43, %47 : vector<4x256xf32>
    %c0_31 = arith.constant 0 : index
    %c113 = arith.constant 113 : index
    %49 = vector.load %arg9[%c0_31, %c113] : memref<4x512xf32, #tpu.memory_space<vmem>>, vector<4x256xf32>
    %50 = vector.broadcast %24 : vector<1x256xf32> to vector<4x256xf32>
    %51 = arith.mulf %49, %50 : vector<4x256xf32>
    %c2_32 = arith.constant 2 : index
    %c0_33 = arith.constant 0 : index
    %c0_34 = arith.constant 0 : index
    %52 = vector.load %arg3[%c2_32, %c0_33, %c0_34] : memref<9x4x4xf32, #tpu.memory_space<vmem>>, vector<1x4x4xf32>
    %53 = vector.shape_cast %52 : vector<1x4x4xf32> to vector<4x4xf32>
    %cst_35 = arith.constant dense<0.000000e+00> : vector<4x256xf32>
    %54 = tpu.matmul %53, %51, %cst_35 {dimension_numbers = #tpu.dot_dimension_numbers<[1], [0], [0], [1], [0, 0, 1, 1], [], []>} : vector<4x4xf32>, vector<4x256xf32>, vector<4x256xf32> -> vector<4x256xf32>
    %55 = arith.addf %48, %54 : vector<4x256xf32>
    %c0_36 = arith.constant 0 : index
    %c127 = arith.constant 127 : index
    %56 = vector.load %arg9[%c0_36, %c127] : memref<4x512xf32, #tpu.memory_space<vmem>>, vector<4x256xf32>
    %57 = vector.broadcast %20 : vector<1x256xf32> to vector<4x256xf32>
    %58 = arith.mulf %56, %57 : vector<4x256xf32>
    %c3 = arith.constant 3 : index
    %c0_37 = arith.constant 0 : index
    %c0_38 = arith.constant 0 : index
    %59 = vector.load %arg3[%c3, %c0_37, %c0_38] : memref<9x4x4xf32, #tpu.memory_space<vmem>>, vector<1x4x4xf32>
    %60 = vector.shape_cast %59 : vector<1x4x4xf32> to vector<4x4xf32>
    %cst_39 = arith.constant dense<0.000000e+00> : vector<4x256xf32>
    %61 = tpu.matmul %60, %58, %cst_39 {dimension_numbers = #tpu.dot_dimension_numbers<[1], [0], [0], [1], [0, 0, 1, 1], [], []>} : vector<4x4xf32>, vector<4x256xf32>, vector<4x256xf32> -> vector<4x256xf32>
    %62 = arith.addf %55, %61 : vector<4x256xf32>
    %c0_40 = arith.constant 0 : index
    %c128_41 = arith.constant 128 : index
    %63 = vector.load %arg9[%c0_40, %c128_41] : memref<4x512xf32, #tpu.memory_space<vmem>>, vector<4x256xf32>
    %c4 = arith.constant 4 : index
    %c0_42 = arith.constant 0 : index
    %c0_43 = arith.constant 0 : index
    %64 = vector.load %arg3[%c4, %c0_42, %c0_43] : memref<9x4x4xf32, #tpu.memory_space<vmem>>, vector<1x4x4xf32>
    %65 = vector.shape_cast %64 : vector<1x4x4xf32> to vector<4x4xf32>
    %cst_44 = arith.constant dense<0.000000e+00> : vector<4x256xf32>
    %66 = tpu.matmul %65, %63, %cst_44 {dimension_numbers = #tpu.dot_dimension_numbers<[1], [0], [0], [1], [0, 0, 1, 1], [], []>} : vector<4x4xf32>, vector<4x256xf32>, vector<4x256xf32> -> vector<4x256xf32>
    %67 = arith.addf %62, %66 : vector<4x256xf32>
    %c0_45 = arith.constant 0 : index
    %c129 = arith.constant 129 : index
    %68 = vector.load %arg9[%c0_45, %c129] : memref<4x512xf32, #tpu.memory_space<vmem>>, vector<4x256xf32>
    %69 = vector.broadcast %24 : vector<1x256xf32> to vector<4x256xf32>
    %70 = arith.mulf %68, %69 : vector<4x256xf32>
    %c5 = arith.constant 5 : index
    %c0_46 = arith.constant 0 : index
    %c0_47 = arith.constant 0 : index
    %71 = vector.load %arg3[%c5, %c0_46, %c0_47] : memref<9x4x4xf32, #tpu.memory_space<vmem>>, vector<1x4x4xf32>
    %72 = vector.shape_cast %71 : vector<1x4x4xf32> to vector<4x4xf32>
    %cst_48 = arith.constant dense<0.000000e+00> : vector<4x256xf32>
    %73 = tpu.matmul %72, %70, %cst_48 {dimension_numbers = #tpu.dot_dimension_numbers<[1], [0], [0], [1], [0, 0, 1, 1], [], []>} : vector<4x4xf32>, vector<4x256xf32>, vector<4x256xf32> -> vector<4x256xf32>
    %74 = arith.addf %67, %73 : vector<4x256xf32>
    %c0_49 = arith.constant 0 : index
    %c143 = arith.constant 143 : index
    %75 = vector.load %arg9[%c0_49, %c143] : memref<4x512xf32, #tpu.memory_space<vmem>>, vector<4x256xf32>
    %76 = vector.broadcast %20 : vector<1x256xf32> to vector<4x256xf32>
    %77 = arith.mulf %75, %76 : vector<4x256xf32>
    %c6 = arith.constant 6 : index
    %c0_50 = arith.constant 0 : index
    %c0_51 = arith.constant 0 : index
    %78 = vector.load %arg3[%c6, %c0_50, %c0_51] : memref<9x4x4xf32, #tpu.memory_space<vmem>>, vector<1x4x4xf32>
    %79 = vector.shape_cast %78 : vector<1x4x4xf32> to vector<4x4xf32>
    %cst_52 = arith.constant dense<0.000000e+00> : vector<4x256xf32>
    %80 = tpu.matmul %79, %77, %cst_52 {dimension_numbers = #tpu.dot_dimension_numbers<[1], [0], [0], [1], [0, 0, 1, 1], [], []>} : vector<4x4xf32>, vector<4x256xf32>, vector<4x256xf32> -> vector<4x256xf32>
    %81 = arith.addf %74, %80 : vector<4x256xf32>
    %c0_53 = arith.constant 0 : index
    %c144 = arith.constant 144 : index
    %82 = vector.load %arg9[%c0_53, %c144] : memref<4x512xf32, #tpu.memory_space<vmem>>, vector<4x256xf32>
    %c7 = arith.constant 7 : index
    %c0_54 = arith.constant 0 : index
    %c0_55 = arith.constant 0 : index
    %83 = vector.load %arg3[%c7, %c0_54, %c0_55] : memref<9x4x4xf32, #tpu.memory_space<vmem>>, vector<1x4x4xf32>
    %84 = vector.shape_cast %83 : vector<1x4x4xf32> to vector<4x4xf32>
    %cst_56 = arith.constant dense<0.000000e+00> : vector<4x256xf32>
    %85 = tpu.matmul %84, %82, %cst_56 {dimension_numbers = #tpu.dot_dimension_numbers<[1], [0], [0], [1], [0, 0, 1, 1], [], []>} : vector<4x4xf32>, vector<4x256xf32>, vector<4x256xf32> -> vector<4x256xf32>
    %86 = arith.addf %81, %85 : vector<4x256xf32>
    %c0_57 = arith.constant 0 : index
    %c145 = arith.constant 145 : index
    %87 = vector.load %arg9[%c0_57, %c145] : memref<4x512xf32, #tpu.memory_space<vmem>>, vector<4x256xf32>
    %88 = vector.broadcast %24 : vector<1x256xf32> to vector<4x256xf32>
    %89 = arith.mulf %87, %88 : vector<4x256xf32>
    %c8 = arith.constant 8 : index
    %c0_58 = arith.constant 0 : index
    %c0_59 = arith.constant 0 : index
    %90 = vector.load %arg3[%c8, %c0_58, %c0_59] : memref<9x4x4xf32, #tpu.memory_space<vmem>>, vector<1x4x4xf32>
    %91 = vector.shape_cast %90 : vector<1x4x4xf32> to vector<4x4xf32>
    %cst_60 = arith.constant dense<0.000000e+00> : vector<4x256xf32>
    %92 = tpu.matmul %91, %89, %cst_60 {dimension_numbers = #tpu.dot_dimension_numbers<[1], [0], [0], [1], [0, 0, 1, 1], [], []>} : vector<4x4xf32>, vector<4x256xf32>, vector<4x256xf32> -> vector<4x256xf32>
    %93 = arith.addf %86, %92 : vector<4x256xf32>
    %c0_61 = arith.constant 0 : index
    %c111_62 = arith.constant 111 : index
    %94 = vector.load %arg10[%c0_61, %c111_62] : memref<4x512xf32, #tpu.memory_space<vmem>>, vector<4x256xf32>
    %95 = vector.broadcast %20 : vector<1x256xf32> to vector<4x256xf32>
    %96 = arith.mulf %94, %95 : vector<4x256xf32>
    %c0_63 = arith.constant 0 : index
    %c0_64 = arith.constant 0 : index
    %c0_65 = arith.constant 0 : index
    %97 = vector.load %arg4[%c0_63, %c0_64, %c0_65] : memref<9x4x4xf32, #tpu.memory_space<vmem>>, vector<1x4x4xf32>
    %98 = vector.shape_cast %97 : vector<1x4x4xf32> to vector<4x4xf32>
    %cst_66 = arith.constant dense<0.000000e+00> : vector<4x256xf32>
    %99 = tpu.matmul %98, %96, %cst_66 {dimension_numbers = #tpu.dot_dimension_numbers<[1], [0], [0], [1], [0, 0, 1, 1], [], []>} : vector<4x4xf32>, vector<4x256xf32>, vector<4x256xf32> -> vector<4x256xf32>
    %c0_67 = arith.constant 0 : index
    %c112_68 = arith.constant 112 : index
    %100 = vector.load %arg10[%c0_67, %c112_68] : memref<4x512xf32, #tpu.memory_space<vmem>>, vector<4x256xf32>
    %c1_69 = arith.constant 1 : index
    %c0_70 = arith.constant 0 : index
    %c0_71 = arith.constant 0 : index
    %101 = vector.load %arg4[%c1_69, %c0_70, %c0_71] : memref<9x4x4xf32, #tpu.memory_space<vmem>>, vector<1x4x4xf32>
    %102 = vector.shape_cast %101 : vector<1x4x4xf32> to vector<4x4xf32>
    %cst_72 = arith.constant dense<0.000000e+00> : vector<4x256xf32>
    %103 = tpu.matmul %102, %100, %cst_72 {dimension_numbers = #tpu.dot_dimension_numbers<[1], [0], [0], [1], [0, 0, 1, 1], [], []>} : vector<4x4xf32>, vector<4x256xf32>, vector<4x256xf32> -> vector<4x256xf32>
    %104 = arith.addf %99, %103 : vector<4x256xf32>
    %c0_73 = arith.constant 0 : index
    %c113_74 = arith.constant 113 : index
    %105 = vector.load %arg10[%c0_73, %c113_74] : memref<4x512xf32, #tpu.memory_space<vmem>>, vector<4x256xf32>
    %106 = vector.broadcast %24 : vector<1x256xf32> to vector<4x256xf32>
    %107 = arith.mulf %105, %106 : vector<4x256xf32>
    %c2_75 = arith.constant 2 : index
    %c0_76 = arith.constant 0 : index
    %c0_77 = arith.constant 0 : index
    %108 = vector.load %arg4[%c2_75, %c0_76, %c0_77] : memref<9x4x4xf32, #tpu.memory_space<vmem>>, vector<1x4x4xf32>
    %109 = vector.shape_cast %108 : vector<1x4x4xf32> to vector<4x4xf32>
    %cst_78 = arith.constant dense<0.000000e+00> : vector<4x256xf32>
    %110 = tpu.matmul %109, %107, %cst_78 {dimension_numbers = #tpu.dot_dimension_numbers<[1], [0], [0], [1], [0, 0, 1, 1], [], []>} : vector<4x4xf32>, vector<4x256xf32>, vector<4x256xf32> -> vector<4x256xf32>
    %111 = arith.addf %104, %110 : vector<4x256xf32>
    %c0_79 = arith.constant 0 : index
    %c127_80 = arith.constant 127 : index
    %112 = vector.load %arg10[%c0_79, %c127_80] : memref<4x512xf32, #tpu.memory_space<vmem>>, vector<4x256xf32>
    %113 = vector.broadcast %20 : vector<1x256xf32> to vector<4x256xf32>
    %114 = arith.mulf %112, %113 : vector<4x256xf32>
    %c3_81 = arith.constant 3 : index
    %c0_82 = arith.constant 0 : index
    %c0_83 = arith.constant 0 : index
    %115 = vector.load %arg4[%c3_81, %c0_82, %c0_83] : memref<9x4x4xf32, #tpu.memory_space<vmem>>, vector<1x4x4xf32>
    %116 = vector.shape_cast %115 : vector<1x4x4xf32> to vector<4x4xf32>
    %cst_84 = arith.constant dense<0.000000e+00> : vector<4x256xf32>
    %117 = tpu.matmul %116, %114, %cst_84 {dimension_numbers = #tpu.dot_dimension_numbers<[1], [0], [0], [1], [0, 0, 1, 1], [], []>} : vector<4x4xf32>, vector<4x256xf32>, vector<4x256xf32> -> vector<4x256xf32>
    %118 = arith.addf %111, %117 : vector<4x256xf32>
    %c0_85 = arith.constant 0 : index
    %c128_86 = arith.constant 128 : index
    %119 = vector.load %arg10[%c0_85, %c128_86] : memref<4x512xf32, #tpu.memory_space<vmem>>, vector<4x256xf32>
    %c4_87 = arith.constant 4 : index
    %c0_88 = arith.constant 0 : index
    %c0_89 = arith.constant 0 : index
    %120 = vector.load %arg4[%c4_87, %c0_88, %c0_89] : memref<9x4x4xf32, #tpu.memory_space<vmem>>, vector<1x4x4xf32>
    %121 = vector.shape_cast %120 : vector<1x4x4xf32> to vector<4x4xf32>
    %cst_90 = arith.constant dense<0.000000e+00> : vector<4x256xf32>
    %122 = tpu.matmul %121, %119, %cst_90 {dimension_numbers = #tpu.dot_dimension_numbers<[1], [0], [0], [1], [0, 0, 1, 1], [], []>} : vector<4x4xf32>, vector<4x256xf32>, vector<4x256xf32> -> vector<4x256xf32>
    %123 = arith.addf %118, %122 : vector<4x256xf32>
    %c0_91 = arith.constant 0 : index
    %c129_92 = arith.constant 129 : index
    %124 = vector.load %arg10[%c0_91, %c129_92] : memref<4x512xf32, #tpu.memory_space<vmem>>, vector<4x256xf32>
    %125 = vector.broadcast %24 : vector<1x256xf32> to vector<4x256xf32>
    %126 = arith.mulf %124, %125 : vector<4x256xf32>
    %c5_93 = arith.constant 5 : index
    %c0_94 = arith.constant 0 : index
    %c0_95 = arith.constant 0 : index
    %127 = vector.load %arg4[%c5_93, %c0_94, %c0_95] : memref<9x4x4xf32, #tpu.memory_space<vmem>>, vector<1x4x4xf32>
    %128 = vector.shape_cast %127 : vector<1x4x4xf32> to vector<4x4xf32>
    %cst_96 = arith.constant dense<0.000000e+00> : vector<4x256xf32>
    %129 = tpu.matmul %128, %126, %cst_96 {dimension_numbers = #tpu.dot_dimension_numbers<[1], [0], [0], [1], [0, 0, 1, 1], [], []>} : vector<4x4xf32>, vector<4x256xf32>, vector<4x256xf32> -> vector<4x256xf32>
    %130 = arith.addf %123, %129 : vector<4x256xf32>
    %c0_97 = arith.constant 0 : index
    %c143_98 = arith.constant 143 : index
    %131 = vector.load %arg10[%c0_97, %c143_98] : memref<4x512xf32, #tpu.memory_space<vmem>>, vector<4x256xf32>
    %132 = vector.broadcast %20 : vector<1x256xf32> to vector<4x256xf32>
    %133 = arith.mulf %131, %132 : vector<4x256xf32>
    %c6_99 = arith.constant 6 : index
    %c0_100 = arith.constant 0 : index
    %c0_101 = arith.constant 0 : index
    %134 = vector.load %arg4[%c6_99, %c0_100, %c0_101] : memref<9x4x4xf32, #tpu.memory_space<vmem>>, vector<1x4x4xf32>
    %135 = vector.shape_cast %134 : vector<1x4x4xf32> to vector<4x4xf32>
    %cst_102 = arith.constant dense<0.000000e+00> : vector<4x256xf32>
    %136 = tpu.matmul %135, %133, %cst_102 {dimension_numbers = #tpu.dot_dimension_numbers<[1], [0], [0], [1], [0, 0, 1, 1], [], []>} : vector<4x4xf32>, vector<4x256xf32>, vector<4x256xf32> -> vector<4x256xf32>
    %137 = arith.addf %130, %136 : vector<4x256xf32>
    %c0_103 = arith.constant 0 : index
    %c144_104 = arith.constant 144 : index
    %138 = vector.load %arg10[%c0_103, %c144_104] : memref<4x512xf32, #tpu.memory_space<vmem>>, vector<4x256xf32>
    %c7_105 = arith.constant 7 : index
    %c0_106 = arith.constant 0 : index
    %c0_107 = arith.constant 0 : index
    %139 = vector.load %arg4[%c7_105, %c0_106, %c0_107] : memref<9x4x4xf32, #tpu.memory_space<vmem>>, vector<1x4x4xf32>
    %140 = vector.shape_cast %139 : vector<1x4x4xf32> to vector<4x4xf32>
    %cst_108 = arith.constant dense<0.000000e+00> : vector<4x256xf32>
    %141 = tpu.matmul %140, %138, %cst_108 {dimension_numbers = #tpu.dot_dimension_numbers<[1], [0], [0], [1], [0, 0, 1, 1], [], []>} : vector<4x4xf32>, vector<4x256xf32>, vector<4x256xf32> -> vector<4x256xf32>
    %142 = arith.addf %137, %141 : vector<4x256xf32>
    %c0_109 = arith.constant 0 : index
    %c145_110 = arith.constant 145 : index
    %143 = vector.load %arg10[%c0_109, %c145_110] : memref<4x512xf32, #tpu.memory_space<vmem>>, vector<4x256xf32>
    %144 = vector.broadcast %24 : vector<1x256xf32> to vector<4x256xf32>
    %145 = arith.mulf %143, %144 : vector<4x256xf32>
    %c8_111 = arith.constant 8 : index
    %c0_112 = arith.constant 0 : index
    %c0_113 = arith.constant 0 : index
    %146 = vector.load %arg4[%c8_111, %c0_112, %c0_113] : memref<9x4x4xf32, #tpu.memory_space<vmem>>, vector<1x4x4xf32>
    %147 = vector.shape_cast %146 : vector<1x4x4xf32> to vector<4x4xf32>
    %cst_114 = arith.constant dense<0.000000e+00> : vector<4x256xf32>
    %148 = tpu.matmul %147, %145, %cst_114 {dimension_numbers = #tpu.dot_dimension_numbers<[1], [0], [0], [1], [0, 0, 1, 1], [], []>} : vector<4x4xf32>, vector<4x256xf32>, vector<4x256xf32> -> vector<4x256xf32>
    %149 = arith.addf %142, %148 : vector<4x256xf32>
    %150 = arith.addf %93, %149 : vector<4x256xf32>
    %151 = vector.broadcast %35 : vector<4x1xf32> to vector<4x256xf32>
    %152 = arith.addf %150, %151 : vector<4x256xf32>
    %cst_115 = arith.constant 0.000000e+00 : f32
    %153 = vector.broadcast %cst_115 : f32 to vector<4x256xf32>
    %154 = arith.cmpf oge, %152, %153 : vector<4x256xf32>
    %cst_116 = arith.constant 0.00999999977 : f32
    %155 = vector.broadcast %cst_116 : f32 to vector<4x256xf32>
    %156 = arith.mulf %155, %152 : vector<4x256xf32>
    %157 = arith.select %154, %152, %156 : vector<4x256xi1>, vector<4x256xf32>
    %158 = vector.broadcast %36 : vector<4x1xf32> to vector<4x256xf32>
    %159 = arith.mulf %157, %158 : vector<4x256xf32>
    %160 = vector.broadcast %37 : vector<4x1xf32> to vector<4x256xf32>
    %161 = arith.addf %159, %160 : vector<4x256xf32>
    %c0_117 = arith.constant 0 : index
    %c128_118 = arith.constant 128 : index
    %162 = vector.load %arg9[%c0_117, %c128_118] : memref<4x512xf32, #tpu.memory_space<vmem>>, vector<4x256xf32>
    tpu.vector_store %arg9[%c0_117, %c128_118], %161 {strides = array<i32>} : memref<4x512xf32, #tpu.memory_space<vmem>>, vector<4x256xf32>,
    %c0_119 = arith.constant 0 : index
    %c3_120 = arith.constant 3 : index
    %163 = vector.load %arg7[%c0_119, %c3_120] : memref<4x7xf32, #tpu.memory_space<vmem>>, vector<4x1xf32>
    %c0_121 = arith.constant 0 : index
    %c4_122 = arith.constant 4 : index
    %164 = vector.load %arg7[%c0_121, %c4_122] : memref<4x7xf32, #tpu.memory_space<vmem>>, vector<4x1xf32>
    %c0_123 = arith.constant 0 : index
    %c111_124 = arith.constant 111 : index
    %165 = vector.load %arg9[%c0_123, %c111_124] : memref<4x512xf32, #tpu.memory_space<vmem>>, vector<4x256xf32>
    %166 = vector.broadcast %20 : vector<1x256xf32> to vector<4x256xf32>
    %167 = arith.mulf %165, %166 : vector<4x256xf32>
    %c0_125 = arith.constant 0 : index
    %c0_126 = arith.constant 0 : index
    %c0_127 = arith.constant 0 : index
    %168 = vector.load %arg5[%c0_125, %c0_126, %c0_127] : memref<9x4x4xf32, #tpu.memory_space<vmem>>, vector<1x4x4xf32>
    %169 = vector.shape_cast %168 : vector<1x4x4xf32> to vector<4x4xf32>
    %cst_128 = arith.constant dense<0.000000e+00> : vector<4x256xf32>
    %170 = tpu.matmul %169, %167, %cst_128 {dimension_numbers = #tpu.dot_dimension_numbers<[1], [0], [0], [1], [0, 0, 1, 1], [], []>} : vector<4x4xf32>, vector<4x256xf32>, vector<4x256xf32> -> vector<4x256xf32>
    %c0_129 = arith.constant 0 : index
    %c112_130 = arith.constant 112 : index
    %171 = vector.load %arg9[%c0_129, %c112_130] : memref<4x512xf32, #tpu.memory_space<vmem>>, vector<4x256xf32>
    %c1_131 = arith.constant 1 : index
    %c0_132 = arith.constant 0 : index
    %c0_133 = arith.constant 0 : index
    %172 = vector.load %arg5[%c1_131, %c0_132, %c0_133] : memref<9x4x4xf32, #tpu.memory_space<vmem>>, vector<1x4x4xf32>
    %173 = vector.shape_cast %172 : vector<1x4x4xf32> to vector<4x4xf32>
    %cst_134 = arith.constant dense<0.000000e+00> : vector<4x256xf32>
    %174 = tpu.matmul %173, %171, %cst_134 {dimension_numbers = #tpu.dot_dimension_numbers<[1], [0], [0], [1], [0, 0, 1, 1], [], []>} : vector<4x4xf32>, vector<4x256xf32>, vector<4x256xf32> -> vector<4x256xf32>
    %175 = arith.addf %170, %174 : vector<4x256xf32>
    %c0_135 = arith.constant 0 : index
    %c113_136 = arith.constant 113 : index
    %176 = vector.load %arg9[%c0_135, %c113_136] : memref<4x512xf32, #tpu.memory_space<vmem>>, vector<4x256xf32>
    %177 = vector.broadcast %24 : vector<1x256xf32> to vector<4x256xf32>
    %178 = arith.mulf %176, %177 : vector<4x256xf32>
    %c2_137 = arith.constant 2 : index
    %c0_138 = arith.constant 0 : index
    %c0_139 = arith.constant 0 : index
    %179 = vector.load %arg5[%c2_137, %c0_138, %c0_139] : memref<9x4x4xf32, #tpu.memory_space<vmem>>, vector<1x4x4xf32>
    %180 = vector.shape_cast %179 : vector<1x4x4xf32> to vector<4x4xf32>
    %cst_140 = arith.constant dense<0.000000e+00> : vector<4x256xf32>
    %181 = tpu.matmul %180, %178, %cst_140 {dimension_numbers = #tpu.dot_dimension_numbers<[1], [0], [0], [1], [0, 0, 1, 1], [], []>} : vector<4x4xf32>, vector<4x256xf32>, vector<4x256xf32> -> vector<4x256xf32>
    %182 = arith.addf %175, %181 : vector<4x256xf32>
    %c0_141 = arith.constant 0 : index
    %c127_142 = arith.constant 127 : index
    %183 = vector.load %arg9[%c0_141, %c127_142] : memref<4x512xf32, #tpu.memory_space<vmem>>, vector<4x256xf32>
    %184 = vector.broadcast %20 : vector<1x256xf32> to vector<4x256xf32>
    %185 = arith.mulf %183, %184 : vector<4x256xf32>
    %c3_143 = arith.constant 3 : index
    %c0_144 = arith.constant 0 : index
    %c0_145 = arith.constant 0 : index
    %186 = vector.load %arg5[%c3_143, %c0_144, %c0_145] : memref<9x4x4xf32, #tpu.memory_space<vmem>>, vector<1x4x4xf32>
    %187 = vector.shape_cast %186 : vector<1x4x4xf32> to vector<4x4xf32>
    %cst_146 = arith.constant dense<0.000000e+00> : vector<4x256xf32>
    %188 = tpu.matmul %187, %185, %cst_146 {dimension_numbers = #tpu.dot_dimension_numbers<[1], [0], [0], [1], [0, 0, 1, 1], [], []>} : vector<4x4xf32>, vector<4x256xf32>, vector<4x256xf32> -> vector<4x256xf32>
    %189 = arith.addf %182, %188 : vector<4x256xf32>
    %c0_147 = arith.constant 0 : index
    %c128_148 = arith.constant 128 : index
    %190 = vector.load %arg9[%c0_147, %c128_148] : memref<4x512xf32, #tpu.memory_space<vmem>>, vector<4x256xf32>
    %c4_149 = arith.constant 4 : index
    %c0_150 = arith.constant 0 : index
    %c0_151 = arith.constant 0 : index
    %191 = vector.load %arg5[%c4_149, %c0_150, %c0_151] : memref<9x4x4xf32, #tpu.memory_space<vmem>>, vector<1x4x4xf32>
    %192 = vector.shape_cast %191 : vector<1x4x4xf32> to vector<4x4xf32>
    %cst_152 = arith.constant dense<0.000000e+00> : vector<4x256xf32>
    %193 = tpu.matmul %192, %190, %cst_152 {dimension_numbers = #tpu.dot_dimension_numbers<[1], [0], [0], [1], [0, 0, 1, 1], [], []>} : vector<4x4xf32>, vector<4x256xf32>, vector<4x256xf32> -> vector<4x256xf32>
    %194 = arith.addf %189, %193 : vector<4x256xf32>
    %c0_153 = arith.constant 0 : index
    %c129_154 = arith.constant 129 : index
    %195 = vector.load %arg9[%c0_153, %c129_154] : memref<4x512xf32, #tpu.memory_space<vmem>>, vector<4x256xf32>
    %196 = vector.broadcast %24 : vector<1x256xf32> to vector<4x256xf32>
    %197 = arith.mulf %195, %196 : vector<4x256xf32>
    %c5_155 = arith.constant 5 : index
    %c0_156 = arith.constant 0 : index
    %c0_157 = arith.constant 0 : index
    %198 = vector.load %arg5[%c5_155, %c0_156, %c0_157] : memref<9x4x4xf32, #tpu.memory_space<vmem>>, vector<1x4x4xf32>
    %199 = vector.shape_cast %198 : vector<1x4x4xf32> to vector<4x4xf32>
    %cst_158 = arith.constant dense<0.000000e+00> : vector<4x256xf32>
    %200 = tpu.matmul %199, %197, %cst_158 {dimension_numbers = #tpu.dot_dimension_numbers<[1], [0], [0], [1], [0, 0, 1, 1], [], []>} : vector<4x4xf32>, vector<4x256xf32>, vector<4x256xf32> -> vector<4x256xf32>
    %201 = arith.addf %194, %200 : vector<4x256xf32>
    %c0_159 = arith.constant 0 : index
    %c143_160 = arith.constant 143 : index
    %202 = vector.load %arg9[%c0_159, %c143_160] : memref<4x512xf32, #tpu.memory_space<vmem>>, vector<4x256xf32>
    %203 = vector.broadcast %20 : vector<1x256xf32> to vector<4x256xf32>
    %204 = arith.mulf %202, %203 : vector<4x256xf32>
    %c6_161 = arith.constant 6 : index
    %c0_162 = arith.constant 0 : index
    %c0_163 = arith.constant 0 : index
    %205 = vector.load %arg5[%c6_161, %c0_162, %c0_163] : memref<9x4x4xf32, #tpu.memory_space<vmem>>, vector<1x4x4xf32>
    %206 = vector.shape_cast %205 : vector<1x4x4xf32> to vector<4x4xf32>
    %cst_164 = arith.constant dense<0.000000e+00> : vector<4x256xf32>
    %207 = tpu.matmul %206, %204, %cst_164 {dimension_numbers = #tpu.dot_dimension_numbers<[1], [0], [0], [1], [0, 0, 1, 1], [], []>} : vector<4x4xf32>, vector<4x256xf32>, vector<4x256xf32> -> vector<4x256xf32>
    %208 = arith.addf %201, %207 : vector<4x256xf32>
    %c0_165 = arith.constant 0 : index
    %c144_166 = arith.constant 144 : index
    %209 = vector.load %arg9[%c0_165, %c144_166] : memref<4x512xf32, #tpu.memory_space<vmem>>, vector<4x256xf32>
    %c7_167 = arith.constant 7 : index
    %c0_168 = arith.constant 0 : index
    %c0_169 = arith.constant 0 : index
    %210 = vector.load %arg5[%c7_167, %c0_168, %c0_169] : memref<9x4x4xf32, #tpu.memory_space<vmem>>, vector<1x4x4xf32>
    %211 = vector.shape_cast %210 : vector<1x4x4xf32> to vector<4x4xf32>
    %cst_170 = arith.constant dense<0.000000e+00> : vector<4x256xf32>
    %212 = tpu.matmul %211, %209, %cst_170 {dimension_numbers = #tpu.dot_dimension_numbers<[1], [0], [0], [1], [0, 0, 1, 1], [], []>} : vector<4x4xf32>, vector<4x256xf32>, vector<4x256xf32> -> vector<4x256xf32>
    %213 = arith.addf %208, %212 : vector<4x256xf32>
    %c0_171 = arith.constant 0 : index
    %c145_172 = arith.constant 145 : index
    %214 = vector.load %arg9[%c0_171, %c145_172] : memref<4x512xf32, #tpu.memory_space<vmem>>, vector<4x256xf32>
    %215 = vector.broadcast %24 : vector<1x256xf32> to vector<4x256xf32>
    %216 = arith.mulf %214, %215 : vector<4x256xf32>
    %c8_173 = arith.constant 8 : index
    %c0_174 = arith.constant 0 : index
    %c0_175 = arith.constant 0 : index
    %217 = vector.load %arg5[%c8_173, %c0_174, %c0_175] : memref<9x4x4xf32, #tpu.memory_space<vmem>>, vector<1x4x4xf32>
    %218 = vector.shape_cast %217 : vector<1x4x4xf32> to vector<4x4xf32>
    %cst_176 = arith.constant dense<0.000000e+00> : vector<4x256xf32>
    %219 = tpu.matmul %218, %216, %cst_176 {dimension_numbers = #tpu.dot_dimension_numbers<[1], [0], [0], [1], [0, 0, 1, 1], [], []>} : vector<4x4xf32>, vector<4x256xf32>, vector<4x256xf32> -> vector<4x256xf32>
    %220 = arith.addf %213, %219 : vector<4x256xf32>
    %221 = vector.broadcast %163 : vector<4x1xf32> to vector<4x256xf32>
    %222 = arith.mulf %220, %221 : vector<4x256xf32>
    %223 = vector.broadcast %164 : vector<4x1xf32> to vector<4x256xf32>
    %224 = arith.addf %222, %223 : vector<4x256xf32>
    %cst_177 = arith.constant 0.000000e+00 : f32
    %225 = vector.broadcast %cst_177 : f32 to vector<4x256xf32>
    %226 = arith.maximumf %224, %225 : vector<4x256xf32>
    %c0_178 = arith.constant 0 : index
    %c128_179 = arith.constant 128 : index
    %227 = vector.load %arg9[%c0_178, %c128_179] : memref<4x512xf32, #tpu.memory_space<vmem>>, vector<4x256xf32>
    tpu.vector_store %arg9[%c0_178, %c128_179], %226 {strides = array<i32>} : memref<4x512xf32, #tpu.memory_space<vmem>>, vector<4x256xf32>,
    %c0_180 = arith.constant 0 : index
    %c5_181 = arith.constant 5 : index
    %228 = vector.load %arg7[%c0_180, %c5_181] : memref<4x7xf32, #tpu.memory_space<vmem>>, vector<4x1xf32>
    %c0_182 = arith.constant 0 : index
    %c6_183 = arith.constant 6 : index
    %229 = vector.load %arg7[%c0_182, %c6_183] : memref<4x7xf32, #tpu.memory_space<vmem>>, vector<4x1xf32>
    %c0_184 = arith.constant 0 : index
    %c111_185 = arith.constant 111 : index
    %230 = vector.load %arg9[%c0_184, %c111_185] : memref<4x512xf32, #tpu.memory_space<vmem>>, vector<4x256xf32>
    %231 = vector.broadcast %20 : vector<1x256xf32> to vector<4x256xf32>
    %232 = arith.mulf %230, %231 : vector<4x256xf32>
    %c0_186 = arith.constant 0 : index
    %c0_187 = arith.constant 0 : index
    %c0_188 = arith.constant 0 : index
    %233 = vector.load %arg6[%c0_186, %c0_187, %c0_188] : memref<9x4x4xf32, #tpu.memory_space<vmem>>, vector<1x4x4xf32>
    %234 = vector.shape_cast %233 : vector<1x4x4xf32> to vector<4x4xf32>
    %cst_189 = arith.constant dense<0.000000e+00> : vector<4x256xf32>
    %235 = tpu.matmul %234, %232, %cst_189 {dimension_numbers = #tpu.dot_dimension_numbers<[1], [0], [0], [1], [0, 0, 1, 1], [], []>} : vector<4x4xf32>, vector<4x256xf32>, vector<4x256xf32> -> vector<4x256xf32>
    %c0_190 = arith.constant 0 : index
    %c112_191 = arith.constant 112 : index
    %236 = vector.load %arg9[%c0_190, %c112_191] : memref<4x512xf32, #tpu.memory_space<vmem>>, vector<4x256xf32>
    %c1_192 = arith.constant 1 : index
    %c0_193 = arith.constant 0 : index
    %c0_194 = arith.constant 0 : index
    %237 = vector.load %arg6[%c1_192, %c0_193, %c0_194] : memref<9x4x4xf32, #tpu.memory_space<vmem>>, vector<1x4x4xf32>
    %238 = vector.shape_cast %237 : vector<1x4x4xf32> to vector<4x4xf32>
    %cst_195 = arith.constant dense<0.000000e+00> : vector<4x256xf32>
    %239 = tpu.matmul %238, %236, %cst_195 {dimension_numbers = #tpu.dot_dimension_numbers<[1], [0], [0], [1], [0, 0, 1, 1], [], []>} : vector<4x4xf32>, vector<4x256xf32>, vector<4x256xf32> -> vector<4x256xf32>
    %240 = arith.addf %235, %239 : vector<4x256xf32>
    %c0_196 = arith.constant 0 : index
    %c113_197 = arith.constant 113 : index
    %241 = vector.load %arg9[%c0_196, %c113_197] : memref<4x512xf32, #tpu.memory_space<vmem>>, vector<4x256xf32>
    %242 = vector.broadcast %24 : vector<1x256xf32> to vector<4x256xf32>
    %243 = arith.mulf %241, %242 : vector<4x256xf32>
    %c2_198 = arith.constant 2 : index
    %c0_199 = arith.constant 0 : index
    %c0_200 = arith.constant 0 : index
    %244 = vector.load %arg6[%c2_198, %c0_199, %c0_200] : memref<9x4x4xf32, #tpu.memory_space<vmem>>, vector<1x4x4xf32>
    %245 = vector.shape_cast %244 : vector<1x4x4xf32> to vector<4x4xf32>
    %cst_201 = arith.constant dense<0.000000e+00> : vector<4x256xf32>
    %246 = tpu.matmul %245, %243, %cst_201 {dimension_numbers = #tpu.dot_dimension_numbers<[1], [0], [0], [1], [0, 0, 1, 1], [], []>} : vector<4x4xf32>, vector<4x256xf32>, vector<4x256xf32> -> vector<4x256xf32>
    %247 = arith.addf %240, %246 : vector<4x256xf32>
    %c0_202 = arith.constant 0 : index
    %c127_203 = arith.constant 127 : index
    %248 = vector.load %arg9[%c0_202, %c127_203] : memref<4x512xf32, #tpu.memory_space<vmem>>, vector<4x256xf32>
    %249 = vector.broadcast %20 : vector<1x256xf32> to vector<4x256xf32>
    %250 = arith.mulf %248, %249 : vector<4x256xf32>
    %c3_204 = arith.constant 3 : index
    %c0_205 = arith.constant 0 : index
    %c0_206 = arith.constant 0 : index
    %251 = vector.load %arg6[%c3_204, %c0_205, %c0_206] : memref<9x4x4xf32, #tpu.memory_space<vmem>>, vector<1x4x4xf32>
    %252 = vector.shape_cast %251 : vector<1x4x4xf32> to vector<4x4xf32>
    %cst_207 = arith.constant dense<0.000000e+00> : vector<4x256xf32>
    %253 = tpu.matmul %252, %250, %cst_207 {dimension_numbers = #tpu.dot_dimension_numbers<[1], [0], [0], [1], [0, 0, 1, 1], [], []>} : vector<4x4xf32>, vector<4x256xf32>, vector<4x256xf32> -> vector<4x256xf32>
    %254 = arith.addf %247, %253 : vector<4x256xf32>
    %c0_208 = arith.constant 0 : index
    %c128_209 = arith.constant 128 : index
    %255 = vector.load %arg9[%c0_208, %c128_209] : memref<4x512xf32, #tpu.memory_space<vmem>>, vector<4x256xf32>
    %c4_210 = arith.constant 4 : index
    %c0_211 = arith.constant 0 : index
    %c0_212 = arith.constant 0 : index
    %256 = vector.load %arg6[%c4_210, %c0_211, %c0_212] : memref<9x4x4xf32, #tpu.memory_space<vmem>>, vector<1x4x4xf32>
    %257 = vector.shape_cast %256 : vector<1x4x4xf32> to vector<4x4xf32>
    %cst_213 = arith.constant dense<0.000000e+00> : vector<4x256xf32>
    %258 = tpu.matmul %257, %255, %cst_213 {dimension_numbers = #tpu.dot_dimension_numbers<[1], [0], [0], [1], [0, 0, 1, 1], [], []>} : vector<4x4xf32>, vector<4x256xf32>, vector<4x256xf32> -> vector<4x256xf32>
    %259 = arith.addf %254, %258 : vector<4x256xf32>
    %c0_214 = arith.constant 0 : index
    %c129_215 = arith.constant 129 : index
    %260 = vector.load %arg9[%c0_214, %c129_215] : memref<4x512xf32, #tpu.memory_space<vmem>>, vector<4x256xf32>
    %261 = vector.broadcast %24 : vector<1x256xf32> to vector<4x256xf32>
    %262 = arith.mulf %260, %261 : vector<4x256xf32>
    %c5_216 = arith.constant 5 : index
    %c0_217 = arith.constant 0 : index
    %c0_218 = arith.constant 0 : index
    %263 = vector.load %arg6[%c5_216, %c0_217, %c0_218] : memref<9x4x4xf32, #tpu.memory_space<vmem>>, vector<1x4x4xf32>
    %264 = vector.shape_cast %263 : vector<1x4x4xf32> to vector<4x4xf32>
    %cst_219 = arith.constant dense<0.000000e+00> : vector<4x256xf32>
    %265 = tpu.matmul %264, %262, %cst_219 {dimension_numbers = #tpu.dot_dimension_numbers<[1], [0], [0], [1], [0, 0, 1, 1], [], []>} : vector<4x4xf32>, vector<4x256xf32>, vector<4x256xf32> -> vector<4x256xf32>
    %266 = arith.addf %259, %265 : vector<4x256xf32>
    %c0_220 = arith.constant 0 : index
    %c143_221 = arith.constant 143 : index
    %267 = vector.load %arg9[%c0_220, %c143_221] : memref<4x512xf32, #tpu.memory_space<vmem>>, vector<4x256xf32>
    %268 = vector.broadcast %20 : vector<1x256xf32> to vector<4x256xf32>
    %269 = arith.mulf %267, %268 : vector<4x256xf32>
    %c6_222 = arith.constant 6 : index
    %c0_223 = arith.constant 0 : index
    %c0_224 = arith.constant 0 : index
    %270 = vector.load %arg6[%c6_222, %c0_223, %c0_224] : memref<9x4x4xf32, #tpu.memory_space<vmem>>, vector<1x4x4xf32>
    %271 = vector.shape_cast %270 : vector<1x4x4xf32> to vector<4x4xf32>
    %cst_225 = arith.constant dense<0.000000e+00> : vector<4x256xf32>
    %272 = tpu.matmul %271, %269, %cst_225 {dimension_numbers = #tpu.dot_dimension_numbers<[1], [0], [0], [1], [0, 0, 1, 1], [], []>} : vector<4x4xf32>, vector<4x256xf32>, vector<4x256xf32> -> vector<4x256xf32>
    %273 = arith.addf %266, %272 : vector<4x256xf32>
    %c0_226 = arith.constant 0 : index
    %c144_227 = arith.constant 144 : index
    %274 = vector.load %arg9[%c0_226, %c144_227] : memref<4x512xf32, #tpu.memory_space<vmem>>, vector<4x256xf32>
    %c7_228 = arith.constant 7 : index
    %c0_229 = arith.constant 0 : index
    %c0_230 = arith.constant 0 : index
    %275 = vector.load %arg6[%c7_228, %c0_229, %c0_230] : memref<9x4x4xf32, #tpu.memory_space<vmem>>, vector<1x4x4xf32>
    %276 = vector.shape_cast %275 : vector<1x4x4xf32> to vector<4x4xf32>
    %cst_231 = arith.constant dense<0.000000e+00> : vector<4x256xf32>
    %277 = tpu.matmul %276, %274, %cst_231 {dimension_numbers = #tpu.dot_dimension_numbers<[1], [0], [0], [1], [0, 0, 1, 1], [], []>} : vector<4x4xf32>, vector<4x256xf32>, vector<4x256xf32> -> vector<4x256xf32>
    %278 = arith.addf %273, %277 : vector<4x256xf32>
    %c0_232 = arith.constant 0 : index
    %c145_233 = arith.constant 145 : index
    %279 = vector.load %arg9[%c0_232, %c145_233] : memref<4x512xf32, #tpu.memory_space<vmem>>, vector<4x256xf32>
    %280 = vector.broadcast %24 : vector<1x256xf32> to vector<4x256xf32>
    %281 = arith.mulf %279, %280 : vector<4x256xf32>
    %c8_234 = arith.constant 8 : index
    %c0_235 = arith.constant 0 : index
    %c0_236 = arith.constant 0 : index
    %282 = vector.load %arg6[%c8_234, %c0_235, %c0_236] : memref<9x4x4xf32, #tpu.memory_space<vmem>>, vector<1x4x4xf32>
    %283 = vector.shape_cast %282 : vector<1x4x4xf32> to vector<4x4xf32>
    %cst_237 = arith.constant dense<0.000000e+00> : vector<4x256xf32>
    %284 = tpu.matmul %283, %281, %cst_237 {dimension_numbers = #tpu.dot_dimension_numbers<[1], [0], [0], [1], [0, 0, 1, 1], [], []>} : vector<4x4xf32>, vector<4x256xf32>, vector<4x256xf32> -> vector<4x256xf32>
    %285 = arith.addf %278, %284 : vector<4x256xf32>
    %286 = vector.broadcast %228 : vector<4x1xf32> to vector<4x256xf32>
    %287 = arith.mulf %285, %286 : vector<4x256xf32>
    %288 = vector.broadcast %229 : vector<4x1xf32> to vector<4x256xf32>
    %289 = arith.addf %287, %288 : vector<4x256xf32>
    %290 = arith.negf %289 : vector<4x256xf32>
    %291 = math.exp %290 : vector<4x256xf32>
    %cst_238 = arith.constant 1.000000e+00 : f32
    %292 = vector.broadcast %cst_238 : f32 to vector<4x256xf32>
    %293 = arith.addf %292, %291 : vector<4x256xf32>
    %294 = arith.divf %292, %293 : vector<4x256xf32>
    %295 = arith.mulf %161, %294 : vector<4x256xf32>
    %296 = arith.addf %295, %30 : vector<4x256xf32>
    %c0_239 = arith.constant 0 : index
    %c0_240 = arith.constant 0 : index
    %c0_241 = arith.constant 0 : index
    %297 = vector.load %arg8[%c0_239, %c0_240, %c0_241] : memref<1x4x256xf32, #tpu.memory_space<vmem>>, vector<1x4x256xf32>
    %298 = vector.shape_cast %297 : vector<1x4x256xf32> to vector<4x256xf32>
    %299 = vector.shape_cast %296 : vector<4x256xf32> to vector<1x4x256xf32>
    tpu.vector_store %arg8[%c0_239, %c0_240, %c0_241], %299 {strides = array<i32>} : memref<1x4x256xf32, #tpu.memory_space<vmem>>, vector<1x4x256xf32>,
    return
  }
  func.func @transform_0(%arg0: i32) -> (i32, i32, i32) {
    %c0_i32 = arith.constant 0 : i32
    %c0_i32_0 = arith.constant 0 : i32
    %c0_i32_1 = arith.constant 0 : i32
    return %arg0, %c0_i32, %c0_i32_0 : i32, i32, i32
  }
  func.func @transform_1(%arg0: i32) -> (i32, i32, i32) {
    %c0_i32 = arith.constant 0 : i32
    %c0_i32_0 = arith.constant 0 : i32
    %c0_i32_1 = arith.constant 0 : i32
    return %arg0, %c0_i32, %c0_i32_0 : i32, i32, i32
  }
  func.func @transform_2(%arg0: i32) -> (i32, i32, i32) {
    %c0_i32 = arith.constant 0 : i32
    %c0_i32_0 = arith.constant 0 : i32
    %c0_i32_1 = arith.constant 0 : i32
    %c0_i32_2 = arith.constant 0 : i32
    return %c0_i32, %c0_i32_0, %c0_i32_1 : i32, i32, i32
  }
  func.func @transform_3(%arg0: i32) -> (i32, i32, i32) {
    %c0_i32 = arith.constant 0 : i32
    %c0_i32_0 = arith.constant 0 : i32
    %c0_i32_1 = arith.constant 0 : i32
    %c0_i32_2 = arith.constant 0 : i32
    return %c0_i32, %c0_i32_0, %c0_i32_1 : i32, i32, i32
  }
  func.func @transform_4(%arg0: i32) -> (i32, i32, i32) {
    %c0_i32 = arith.constant 0 : i32
    %c0_i32_0 = arith.constant 0 : i32
    %c0_i32_1 = arith.constant 0 : i32
    %c0_i32_2 = arith.constant 0 : i32
    return %c0_i32, %c0_i32_0, %c0_i32_1 : i32, i32, i32
  }
  func.func @transform_5(%arg0: i32) -> (i32, i32, i32) {
    %c0_i32 = arith.constant 0 : i32
    %c0_i32_0 = arith.constant 0 : i32
    %c0_i32_1 = arith.constant 0 : i32
    %c0_i32_2 = arith.constant 0 : i32
    return %c0_i32, %c0_i32_0, %c0_i32_1 : i32, i32, i32
  }
  func.func @transform_6(%arg0: i32) -> (i32, i32) {
    %c0_i32 = arith.constant 0 : i32
    %c0_i32_0 = arith.constant 0 : i32
    %c0_i32_1 = arith.constant 0 : i32
    return %c0_i32, %c0_i32_0 : i32, i32
  }
  func.func @transform_7(%arg0: i32) -> (i32, i32, i32) {
    %c0_i32 = arith.constant 0 : i32
    %c0_i32_0 = arith.constant 0 : i32
    %c0_i32_1 = arith.constant 0 : i32
    return %arg0, %c0_i32, %c0_i32_0 : i32, i32, i32
  }
}

</mosaic_0001>

<bundles_post_ra>
// kernel: tpu_custom_call.1
= control target key start
LH: loop header
LB: loop body
LE: loop exit
PB: predicated region body
PF: predicated region fallthrough
CT: control target
= control target key end

     0   :  { %12 = vsyncpa [#allocation5], 0  ;;  %s5087_s0 = inlined_call_operand.vmem [shape: f32[2,4,256], index: 0, kind: input, shape index: {}]   ;;  %s5088_s1 = inlined_call_operand.vmem [shape: f32[2,4,256], index: 1, kind: input, shape index: {}]   ;;  %s5089_s2 = inlined_call_operand.vmem [shape: f32[9,4,4], index: 2, kind: input, shape index: {}]   ;;  %s5090_s3 = inlined_call_operand.vmem [shape: f32[9,4,4], index: 3, kind: input, shape index: {}]   ;;  %s5091_s4 = inlined_call_operand.vmem [shape: f32[9,4,4], index: 4, kind: input, shape index: {}]   ;;  %s5092_s5 = inlined_call_operand.vmem [shape: f32[9,4,4], index: 5, kind: input, shape index: {}]   ;;  %s5093_s6 = inlined_call_operand.vmem [shape: f32[4,7], index: 6, kind: input, shape index: {}]   ;;  %s5094_s7 = inlined_call_operand.hbm [shape: f32[2,4,256], index: 7, kind: output, shape index: {}]  }
   0x1   :  { %14 = vsyncpa [#allocation5 + $0x1], 0  ;;  %s4335_s24 = smov 0   ;;  %s4337_s25 = smov 0  }
   0x2   :  { %s4339_s26 = smov 0   ;;  %s4341_s27 = smov 0  }
   0x3 LB: > { %s4356_s28 = sadd.s32 4294967295, %s4276_s27   ;;  %s3974_s29 = sadd.s32 4294967294, %s4276_s27   ;;  %s4276_s27 = sphi %s4341_s27, %s5100_s27   ;;  %s4272_s26 = sphi %s4339_s26, %s5099_s26   ;;  %s4268_s25 = sphi %s4337_s25, %s5098_s25   ;;  %s4264_s24 = sphi %s4335_s24, %s5097_s24  }
   0x4   : > { %s4360_s30 = sadd.s32 1, %s4276_s27   ;;  %s184_s8 = sadd.s32 1, %s4272_s26 }
   0x5   : > { %s181_s9 = ssub.s32 %s4276_s27, %s4360_s30  ;;  %p194_p0 = scmp.ne.s32.totalorder %s4272_s26, %s4268_s25 }
   0x6   : > { %p182_p1 = scmp.eq.s32.totalorder %s181_s9, 0  ;;  %p195_p2 = scmp.eq.s32.totalorder %s4356_s28, 1 }
   0x7   : > { %p200_p3 = scmp.ne.s32.totalorder %s4268_s25, %s4264_s24  ;;  %p201_p4 = scmp.eq.s32.totalorder %s3974_s29, 1 }
   0x8   : > { %s4371_s10 = scalar_select %p182_p1, %s4272_s26, %s184_s8  }
   0x9   : > { %p4373_p5 = por %p195_p2, %p194_p0  ;;  %p4377_p6 = por %p201_p4, %p200_p3 }
   0xa   : > { %p3977_p7 = scmp.ge.s32.totalorder %s4276_s27, 1  ;;  %p250_p8 = scmp.lt.s32.totalorder %s4276_s27, 3 }
   0xc   : > { %p251_p9 = pnand %p3977_p7, %p250_p8 }
   0xd   : > { %p287_p10 = scmp.lt.s32.totalorder (!%p251_p9), %s4356_s28, 1  ;;  %s4279_s21 = smov (!%p251_p9), 111  }
   0xe   : > { %254 = sbr.rel (%p251_p9) target bundleno = 1350 (0x546), region = 48  ;;  %s4280_s22 = smov (!%p251_p9), 127  }
   0xf   : > { %s4281_s23 = smov (!%p251_p9), 113   ;;  %s4282_s29 = smov (!%p251_p9), 1  }
  0x10   : > { %s4283_s8 = smov (!%p251_p9), 15   ;;  %s4284_s9 = smov (!%p251_p9), 17  }
  0x11   : > { %s4136_s19 = sshll.u32 (!%p251_p9), %s4356_s28, 7 }
  0x12   : > { %s3901_s18 = scalar_lea.hbm (!%p251_p9), %s5094_s7, %s4136_s19 }
  0x13   : > { %v297_v0 = vlaneseq  ;;  %v4278_v1 = vmov 0.0   ;;  %s288_s13 = scalar_select %p287_p10, %s4356_s28, 1  ;;  %v4287_v22 = vmov 0   ;;  %v4288_v23 = vmov 1  }
  0x14   : > { %336 = vst [vmem:[#allocation2] sm:$0xff] %v4278_v1  ;;  %337 = vst [vmem:[#allocation2 + $0x8] sm:$0xff] %v4278_v1  ;;  %447 = vmatprep.mubr.f32.mxu0 %v4278_v1  ;;  %537 = vmatprep.mubr.f32.mxu1 %v4278_v1  ;;  %vm371_vm4 = vcmask 130048   ;;  %vm378_vm5 = vcmask 1043456   ;;  %vm353_vm6 = vcmask 908288   ;;  %vm657_vm7 = vcmask 1039360  }
  0x15   : > { %338 = vst [vmem:[#allocation3] sm:$0xff] %v4278_v1  ;;  %339 = vst [vmem:[#allocation3 + $0x8] sm:$0xff] %v4278_v1  ;;  %v298_v2 = vand.u32 127, %v297_v0  ;;  %s4134_s14 = sshll.u32 %s288_s13, 3  ;;  %s4285_s13 = smov 16   ;;  %4192 = vset.pattern.permute.xlu0 %v4287_v22  ;;  %4193 = vset.pattern.permute.xlu1 %v4288_v23  ;;  %vm552_vm8 = vcmask 924672  }
  0x16   : > { %s291_s17 = scalar_lea.vmem %s5087_s0, %s4134_s14  ;;  %s296_s20 = scalar_lea.vmem %s5088_s1, %s4134_s14  ;;  %vm1061_vm9 = vcmask 916480   ;;  %vm674_vm10 = vcmask 7168   ;;  %vm569_vm11 = vcmask 121856   ;;  %vm463_vm12 = vcmask 138240  }
  0x17   : > { %v299_v3 = vadd.s32 128, %v298_v2  ;;  %v304_v4 = vand.u32 15, %v298_v2  ;;  %v4401_v10 = vld [vmem:[%s291_s17] sm:$0xff]  ;;  %s4286_s14 = smov 112   ;;  %vm374_vm13 = vcmask 31744   ;;  %s4294_s28 = smov [#allocation4]  }
  0x18   : > { %v4403_v11 = vld [vmem:[%s296_s20] sm:$0xff]  ;;  %341 = vst [vmem:[#allocation2 + $0x4] sm:$0xff] %v4401_v10  ;;  %v4423_v18 = vcombine.high %v4401_v10, %v4401_v10 }
  0x19   : > { %v311_v5 = vand.u32 15, %v299_v3  ;;  %vm324_vm0 = vcmp.ge.s32.totalorder %v304_v4, 1  ;;  %vm330_vm1 = vcmp.le.s32.totalorder %v304_v4, 14  ;;  %343 = vst [vmem:[#allocation3 + $0x4] sm:$0xff] %v4403_v11 }
  0x1a   : > { %v3983_v6 = vsel %vm324_vm0, 1.0, %v4278_v1  ;;  %v3985_v8 = vsel %vm330_vm1, 1.0, %v4278_v1 }
  0x1b   : > { %vm325_vm2 = vcmp.ge.s32.totalorder %v311_v5, 1  ;;  %vm331_vm3 = vcmp.le.s32.totalorder %v311_v5, 14  ;;  %v1049_v17 = vld [vmem:[#allocation2 + $0xc] sm:$0xf] }
  0x1c   : > { %v3984_v7 = vsel %vm325_vm2, 1.0, %v4278_v1  ;;  %v3986_v9 = vsel %vm331_vm3, 1.0, %v4278_v1  ;;  %v843_v35 = vld [vmem:[#allocation2 + $0xc] sm:$0xf]  ;;  %v1712_v51 = vld [vmem:[#allocation3 + $0xc] sm:$0xf] }
  0x1d   : > { %v349_v12 = vcombine.low %v3983_v6, %v3984_v7  ;;  %v548_v13 = vcombine.low %v3985_v8, %v3986_v9  ;;  %v946_v40 = vld [vmem:[#allocation2 + $0xc] sm:$0xf]  ;;  %v3987_v7 = vld [vmem:[%s5089_s2 + $0x4] sm:$0xf]  ;;  %v1809_v23 = vld [vmem:[#allocation3 + $0xc] sm:$0xf] }
  0x1e   : > { %v1145_v44 = vld [vmem:[#allocation2 + $0xc] sm:$0xf] }
  0x1f   : > { %350 = vrot.lane.b32.xlu0 %v349_v12, %s4279_s21  ;;  %654 = vrot.lane.b32.xlu1 %v349_v12, %s4280_s22  ;;  %v4413_v14 = vld [vmem:[#allocation2] sm:$0xff]  ;;  %v346_v15 = vld [vmem:[#allocation2 + $0x8] sm:$0xf] }
  0x20   : > { %v364_v16 = vcombine.high %v4413_v14, %v4413_v14  ;;  %v1248_v19 = vld [vmem:[#allocation3 + $0x8] sm:$0xf]  ;;  %v4429_v20 = vld [vmem:[#allocation3] sm:$0xff]  ;;  %v653_v27 = vld [vmem:[#allocation2 + $0x8] sm:$0xf] }
  0x21   : > { %v1256_v21 = vcombine.high %v4429_v20, %v4429_v20  ;;  %v545_v32 = vld [vmem:[#allocation2 + $0x8] sm:$0xf]  ;;  %v1433_v46 = vld [vmem:[#allocation3 + $0x8] sm:$0xf] }
  0x22   : > { %v1530_v58 = vld [vmem:[#allocation3 + $0x8] sm:$0xf] }
  0x23   : > { %549 = vrot.lane.b32.xlu0 %v548_v13, %s4281_s23  ;;  %844 = vrot.lane.b32.xlu1 %v548_v13, %s4282_s29 }
  0x27   : > { %947 = vrot.lane.b32.xlu0 %v349_v12, %s4283_s8  ;;  %1146 = vrot.lane.b32.xlu1 %v548_v13, %s4284_s9 }
  0x2b   : > { %365 = vrot.lane.b32.xlu0 %v4413_v14, %s4285_s13  ;;  %369 = vrot.lane.b32.xlu1 %v346_v15, %s4285_s13 }
  0x2f   : > { %367 = vrot.lane.b32.xlu0 %v364_v16, %s4285_s13  ;;  %1059 = vrot.lane.b32.xlu1 %v1049_v17, %s4286_s14 }
  0x33   : > { %1057 = vrot.lane.b32.xlu0 %v4423_v18, %s4286_s14  ;;  %1261 = vrot.lane.b32.xlu1 %v1248_v19, %s4285_s13 }
  0x37   : > { %1055 = vrot.lane.b32.xlu0 %v4401_v10, %s4286_s14 }
  0x3b   : > { %1259 = vrot.lane.b32.xlu0 %v1256_v21, %s4285_s13 }
  0x3f   : > { %1257 = vrot.lane.b32.xlu0 %v4429_v20, %s4285_s13 }
  0x91   : > { %v351_v24 = vpop.permute.xlu0 %350  ;;  %v655_v25 = vpop.permute.xlu1 %654 }
  0x92   : > { %v4438_v26 = vrot.slane %v351_v24, 4  ;;  %v4440_v28 = vrot.slane %v655_v25, 4 }
  0x94   : > { %v358_v29 = vmul.f32 %v4438_v26, %v346_v15  ;;  %v662_v34 = vmul.f32 %v4440_v28, %v653_v27  ;;  %v1250_v55 = vmul.f32 %v1248_v19, %v4438_v26  ;;  %v4472_v57 = vsel %vm353_vm6, %v4438_v26, %v351_v24 }
  0x95   : > { %v550_v30 = vpop.permute.xlu0 %549  ;;  %v845_v31 = vpop.permute.xlu1 %844  ;;  %v1532_v60 = vmul.f32 %v1530_v58, %v4440_v28  ;;  %v357_v61 = vmul.f32 %v4472_v57, %v4413_v14  ;;  %v4483_v62 = vsel %vm657_vm7, %v4440_v28, %v655_v25  ;;  %v1249_v16 = vmul.f32 %v4429_v20, %v4472_v57 }
  0x96   : > { %v4443_v33 = vrot.slane %v550_v30, 4  ;;  %461 = vrot.lane.b32.xlu0 %v358_v29, %s4284_s9  ;;  %v4447_v36 = vrot.slane %v845_v31, 4  ;;  %v661_v4 = vmul.f32 %v4483_v62, %v4413_v14  ;;  %v1531_v19 = vmul.f32 %v4429_v20, %v4483_v62  ;;  %v1906_v29 = vld [vmem:[#allocation3 + $0xc] sm:$0xf] }
  0x97   : > { %v456_v22 = vcombine.high %v357_v61, %v357_v61 }
  0x98   : > { %v557_v37 = vmul.f32 %v4443_v33, %v545_v32  ;;  %v851_v43 = vmul.f32 %v4447_v36, %v843_v35  ;;  %v1435_v50 = vmul.f32 %v1433_v46, %v4443_v33  ;;  %v1714_v56 = vmul.f32 %v1712_v51, %v4447_v36  ;;  %v2001_v35 = vld [vmem:[#allocation3 + $0xc] sm:$0xf] }
  0x99   : > { %v948_v38 = vpop.permute.xlu0 %947  ;;  %v1147_v39 = vpop.permute.xlu1 %1146  ;;  %v4487_v63 = vsel %vm552_vm8, %v4443_v33, %v550_v30  ;;  %v4501_v5 = vsel %vm674_vm10, %v4447_v36, %v845_v31  ;;  %v667_v25 = vcombine.high %v661_v4, %v661_v4 }
  0x9a   : > { %v4450_v41 = vrot.slane %v948_v38, 4  ;;  %567 = vrot.lane.b32.xlu1 %v557_v37, %s4283_s8  ;;  %672 = vrot.lane.b32.xlu0 %v662_v34, %s4282_s29  ;;  %v4454_v42 = vrot.slane %v1147_v39, 4  ;;  %v556_v3 = vmul.f32 %v4487_v63, %v4413_v14  ;;  %v850_v8 = vmul.f32 %v4501_v5, %v4401_v10 }
  0x9b   : > { %v1434_v13 = vmul.f32 %v4429_v20, %v4487_v63  ;;  %v1713_v17 = vmul.f32 %v4501_v5, %v4403_v11  ;;  %v4547_v20 = vcombine.high %v4403_v11, %v4403_v11 }
  0x9c   : > { %v954_v45 = vmul.f32 %v4450_v41, %v946_v40  ;;  %v1153_v48 = vmul.f32 %v4454_v42, %v1145_v44  ;;  %v4505_v6 = vsel %vm569_vm11, %v4450_v41, %v948_v38  ;;  %v4520_v12 = vsel %vm463_vm12, %v4454_v42, %v1147_v39  ;;  %v344_v39 = vld [vmem:[%s5093_s6] sm:$0xf] }
  0x9d   : > { %v366_v47 = vpop.permute.xlu0 %365  ;;  %v370_v49 = vpop.permute.xlu1 %369  ;;  %v953_v9 = vmul.f32 %v4505_v6, %v4401_v10  ;;  %v1152_v14 = vmul.f32 %v4520_v12, %v4401_v10  ;;  %v562_v15 = vcombine.high %v556_v3, %v556_v3  ;;  %v856_v21 = vcombine.high %v850_v8, %v850_v8 }
  0x9e   : > { %861 = vrot.lane.b32.xlu1 %v851_v43, %s4280_s22  ;;  %964 = vrot.lane.b32.xlu0 %v954_v45, %s4281_s23  ;;  %v1811_v24 = vmul.f32 %v1809_v23, %v4450_v41  ;;  %v1810_v27 = vmul.f32 %v4505_v6, %v4403_v11  ;;  %v1440_v30 = vcombine.high %v1434_v13, %v1434_v13  ;;  %v2692_v43 = vld [vmem:[#allocation2 + $0xc] sm:$0xf] }
  0x9f   : > { %v1719_v31 = vcombine.high %v1713_v17, %v1713_v17  ;;  %v959_v32 = vcombine.high %v953_v9, %v953_v9  ;;  %v1158_v34 = vcombine.high %v1152_v14, %v1152_v14  ;;  %v2003_v37 = vmul.f32 %v2001_v35, %v4454_v42 }
  0xa0   : > { %v1345_v38 = vcombine.high %v1249_v16, %v1249_v16  ;;  %v1537_v40 = vcombine.high %v1531_v19, %v1531_v19  ;;  %v2694_v44 = vmul.f32 %v2692_v43, %v4450_v41  ;;  %v1816_v45 = vcombine.high %v1810_v27, %v1810_v27 }
  0xa1   : > { %v368_v52 = vpop.permute.xlu0 %367  ;;  %v2002_v46 = vmul.f32 %v4520_v12, %v4403_v11 }
  0xa2   : > { %1445 = vrot.lane.b32.xlu1 %v1435_v50, %s4283_s8  ;;  %1163 = vrot.lane.b32.xlu0 %v1153_v48, %s4279_s21  ;;  %v373_v53 = vsel %vm371_vm4, %v368_v52, %v370_v49  ;;  %v372_v54 = vsel %vm371_vm4, %v366_v47, %v368_v52  ;;  %v4289_v48 = vmov 2   ;;  %v2595_v49 = vld [vmem:[#allocation2 + $0xc] sm:$0xf]  ;;  %v1060_v52 = vpop.permute.xlu1 %1059 }
  0xa3   : > { %3988 = vmatprep.subr.msk.mxu0 %vm378_vm5, %v373_v53  ;;  %v2008_v47 = vcombine.high %v2002_v46, %v2002_v46  ;;  %v2597_v50 = vmul.f32 %v2595_v49, %v4447_v36 }
  0xa4   : > { %3989 = vmatpush1.msk.msra.mxu0 %vm378_vm5, %v372_v54 }
  0xa5   : > { %v4474_v59 = vpop.permute.xlu0 %1057  ;;  %3990 = vmatmul.mubr.msk.f32.vlgmr.msra.gmra.mxu0 %vm374_vm13, %v3987_v7 }
  0xa6   : > { %1724 = vrot.lane.b32.xlu1 %v1714_v56, %s4280_s22  ;;  %1350 = vrot.lane.b32.xlu0 %v1250_v55, %s4284_s9  ;;  %v4581_v54 = vpop.permute.xlu1 %1261  ;;  %v1063_v49 = vsel %vm1061_vm9, %v4474_v59, %v1060_v52 }
  0xa7   : > { %643 = vmatprep.mubr.f32.mxu0 %v4278_v1 }
  0xa9   : > { %v1056_v0 = vpop.permute.xlu0 %1055 }
  0xaa   : > { %1542 = vrot.lane.b32.xlu0 %v1532_v60, %s4282_s29  ;;  %457 = vrot.lane.b32.xlu1 %v357_v61, %s4284_s9  ;;  %v4493_v2 = vsel %vm1061_vm9, %v1056_v0, %v4474_v59  ;;  %v4014_v59 = vld [vmem:[%s5089_s2 + $0x1c] sm:$0xf] }
  0xad   : > { %v4577_v51 = vpop.permute.xlu0 %1259 }
  0xae   : > { %563 = vrot.lane.b32.xlu0 %v556_v3, %s4283_s8  ;;  %668 = vrot.lane.b32.xlu1 %v661_v4, %s4282_s29 }
  0xb1   : > { %v4579_v53 = vpop.permute.xlu0 %1257 }
  0xb2   : > { %857 = vrot.lane.b32.xlu0 %v850_v8, %s4280_s22  ;;  %960 = vrot.lane.b32.xlu1 %v953_v9, %s4281_s23 }
  0xb6   : > { %1441 = vrot.lane.b32.xlu0 %v1434_v13, %s4283_s8  ;;  %1159 = vrot.lane.b32.xlu1 %v1152_v14, %s4279_s21 }
  0xba   : > { %565 = vrot.lane.b32.xlu0 %v562_v15, %s4283_s8  ;;  %1346 = vrot.lane.b32.xlu1 %v1249_v16, %s4284_s9 }
  0xbe   : > { %1720 = vrot.lane.b32.xlu0 %v1713_v17, %s4280_s22  ;;  %1538 = vrot.lane.b32.xlu1 %v1531_v19, %s4282_s29 }
  0xc2   : > { %859 = vrot.lane.b32.xlu0 %v856_v21, %s4280_s22  ;;  %459 = vrot.lane.b32.xlu1 %v456_v22, %s4284_s9 }
  0xc6   : > { %1821 = vrot.lane.b32.xlu0 %v1811_v24, %s4281_s23  ;;  %670 = vrot.lane.b32.xlu1 %v667_v25, %s4282_s29  ;;  %v3994_v25 = vld [vmem:[%s5089_s2 + $0x8] sm:$0xf] }
  0xca   : > { %1914 = vrot.lane.b32.xlu0 %v4547_v20, %s4286_s14  ;;  %1817 = vrot.lane.b32.xlu1 %v1810_v27, %s4281_s23 }
  0xce   : > { %1443 = vrot.lane.b32.xlu0 %v1440_v30, %s4283_s8  ;;  %1916 = vrot.lane.b32.xlu1 %v1906_v29, %s4286_s14  ;;  %v4002_v30 = vld [vmem:[%s5089_s2 + $0x10] sm:$0xf] }
  0xd2   : > { %1722 = vrot.lane.b32.xlu0 %v1719_v31, %s4280_s22  ;;  %962 = vrot.lane.b32.xlu1 %v959_v32, %s4281_s23 }
  0xd6   : > { %1912 = vrot.lane.b32.xlu0 %v4403_v11, %s4286_s14  ;;  %1161 = vrot.lane.b32.xlu1 %v1158_v34, %s4279_s21 }
  0xda   : > { %2013 = vrot.lane.b32.xlu0 %v2003_v37, %s4279_s21  ;;  %1348 = vrot.lane.b32.xlu1 %v1345_v38, %s4284_s9  ;;  %v359_v37 = vld [vmem:[%s5089_s2] sm:$0xf] }
  0xde   : > { %2101 = vperm.xlu0 %4192, %v344_v39   ;;  %1540 = vrot.lane.b32.xlu1 %v1537_v40, %s4282_s29 }
  0xe2   : > { %2704 = vrot.lane.b32.xlu0 %v2694_v44, %s4281_s23  ;;  %1819 = vrot.lane.b32.xlu1 %v1816_v45, %s4281_s23  ;;  %v3998_v44 = vld [vmem:[%s5089_s2 + $0xc] sm:$0xf] }
  0xe6   : > { %2011 = vrot.lane.b32.xlu1 %v2008_v47, %s4279_s21 }
  0xea   : > { %2009 = vrot.lane.b32.xlu1 %v2002_v46, %s4279_s21 }
  0xee   : > { %2113 = vperm.xlu1 %4193, %v344_v39  }
  0xf2   : > { %4194 = vset.pattern.permute.xlu1 %v4289_v48 }
  0xf3   : > { %2119 = vperm.xlu1 %4194, %v344_v39  }
  0xf7   : > { %2607 = vrot.lane.b32.xlu1 %v2597_v50, %s4280_s22  ;;  %v4006_v50 = vld [vmem:[%s5089_s2 + $0x14] sm:$0xf] }
 0x108   : > { %v462_v55 = vpop.permute.xlu0 %461 }
 0x10c   : > { %v568_v56 = vpop.permute.xlu1 %567  ;;  %v673_v58 = vpop.permute.xlu0 %672 }
 0x110   : > { %v862_v60 = vpop.permute.xlu1 %861  ;;  %v4583_v61 = vpop.permute.xlu0 %964 }
 0x114   : > { %v4585_v0 = vpop.permute.xlu1 %1445  ;;  %v4587_v3 = vpop.permute.xlu0 %1163 }
 0x118   : > { %v4589_v4 = vpop.permute.xlu1 %1724  ;;  %v4591_v7 = vpop.permute.xlu0 %1350 }
 0x11c   : > { %v4593_v8 = vpop.permute.xlu0 %1542  ;;  %v458_v9 = vpop.permute.xlu1 %457 }
 0x120   : > { %v564_v13 = vpop.permute.xlu0 %563  ;;  %v669_v14 = vpop.permute.xlu1 %668 }
 0x124   : > { %v858_v15 = vpop.permute.xlu0 %857  ;;  %v961_v16 = vpop.permute.xlu1 %960 }
 0x128   : > { %v4595_v17 = vpop.permute.xlu0 %1441  ;;  %v4597_v19 = vpop.permute.xlu1 %1159 }
 0x12c   : > { %v566_v21 = vpop.permute.xlu0 %565  ;;  %v4599_v22 = vpop.permute.xlu1 %1346 }
 0x12d   : > { %v570_v23 = vsel %vm569_vm11, %v564_v13, %v566_v21  ;;  %v571_v24 = vsel %vm569_vm11, %v566_v21, %v568_v56  ;;  %v1264_v56 = vsel %vm371_vm4, %v4577_v51, %v4581_v54  ;;  %v4010_v13 = vld [vmem:[%s5089_s2 + $0x18] sm:$0xf] }
 0x12e   : > { %3995 = vmatprep.subr.msk.mxu0 %vm378_vm5, %v571_v24  ;;  %v4033_v24 = vld [vmem:[%s5090_s3 + $0xc] sm:$0xf] }
 0x12f   : > { %3996 = vmatpush1.msk.msra.mxu0 %vm378_vm5, %v570_v23  ;;  %v1251_v23 = vld [vmem:[%s5090_s3] sm:$0xf] }
 0x130   : > { %v4608_v27 = vpop.permute.xlu0 %1720  ;;  %v4610_v29 = vpop.permute.xlu1 %1538  ;;  %3997 = vmatmul.mubr.msk.f32.vlgmr.msra.gmra.mxu0 %vm374_vm13, %v3994_v25  ;;  %4003 = vmatprep.subr.msk.mxu0 %vm378_vm5, %v4423_v18 }
 0x131   : > { %4004 = vmatpush1.msk.msra.mxu0 %vm378_vm5, %v4401_v10  ;;  %833 = vmatprep.mubr.f32.mxu0 %v4278_v1 }
 0x134   : > { %v860_v31 = vpop.permute.xlu0 %859  ;;  %v460_v32 = vpop.permute.xlu1 %459  ;;  %4005 = vmatmul.mubr.msk.f32.vlgmr.msra.gmra.mxu0 %vm374_vm13, %v4002_v30 }
 0x135   : > { %v465_v34 = vsel %vm463_vm12, %v460_v32, %v462_v55  ;;  %v464_v35 = vsel %vm463_vm12, %v458_v9, %v460_v32  ;;  %1039 = vmatprep.mubr.f32.mxu0 %v4278_v1  ;;  %v864_v45 = vsel %vm657_vm7, %v860_v31, %v862_v60  ;;  %v863_v46 = vsel %vm657_vm7, %v858_v15, %v860_v31  ;;  %v4018_v15 = vld [vmem:[%s5089_s2 + $0x20] sm:$0xf] }
 0x136   : > { %3991 = vmatprep.subr.msk.mxu1 %vm378_vm5, %v465_v34  ;;  %v4045_v34 = vld [vmem:[%s5090_s3 + $0x18] sm:$0xf] }
 0x137   : > { %3992 = vmatpush1.msk.msra.mxu1 %vm378_vm5, %v464_v35 }
 0x138   : > { %v4630_v38 = vpop.permute.xlu0 %1821  ;;  %3993 = vmatmul.mubr.msk.f32.vlgmr.msra.gmra.mxu1 %vm374_vm13, %v359_v37  ;;  %v671_v39 = vpop.permute.xlu1 %670 }
 0x139   : > { %v675_v40 = vsel %vm674_vm10, %v669_v14, %v671_v39  ;;  %v676_v43 = vsel %vm674_vm10, %v671_v39, %v673_v58  ;;  %748 = vmatprep.mubr.f32.mxu1 %v4278_v1  ;;  %v1263_v58 = vsel %vm371_vm4, %v4579_v53, %v4577_v51  ;;  %v4022_v51 = vld [vmem:[%s5090_s3 + $0x4] sm:$0xf] }
 0x13a   : > { %3999 = vmatprep.subr.msk.mxu1 %vm378_vm5, %v676_v43 }
 0x13b   : > { %4000 = vmatpush1.msk.msra.mxu1 %vm378_vm5, %v675_v40  ;;  %v4049_v40 = vld [vmem:[%s5090_s3 + $0x1c] sm:$0xf] }
 0x13c   : > { %v4643_v47 = vpop.permute.xlu0 %1914  ;;  %4001 = vmatmul.mubr.msk.f32.vlgmr.msra.gmra.mxu1 %vm374_vm13, %v3998_v44  ;;  %4007 = vmatprep.subr.msk.mxu1 %vm378_vm5, %v864_v45  ;;  %v4647_v48 = vpop.permute.xlu1 %1817  ;;  %v4053_v44 = vld [vmem:[%s5090_s3 + $0x20] sm:$0xf] }
 0x13d   : > { %4008 = vmatpush1.msk.msra.mxu1 %vm378_vm5, %v863_v46  ;;  %936 = vmatprep.mubr.f32.mxu1 %v4278_v1  ;;  %v2789_v46 = vld [vmem:[#allocation2 + $0xc] sm:$0xf] }
 0x13e   : > { %4015 = vmatprep.subr.msk.mxu1 %vm378_vm5, %v1063_v49  ;;  %2799 = vrot.lane.b32.xlu1 %v2789_v46, %s4286_s14 }
 0x140   : > { %4009 = vmatmul.mubr.msk.f32.vlgmr.msra.gmra.mxu1 %vm374_vm13, %v4006_v50  ;;  %v4658_v55 = vpop.permute.xlu1 %1916  ;;  %v1444_v52 = vpop.permute.xlu0 %1443 }
 0x141   : > { %4016 = vmatpush1.msk.msra.mxu1 %vm378_vm5, %v4493_v2  ;;  %1135 = vmatprep.mubr.f32.mxu1 %v4278_v1  ;;  %v1448_v54 = vsel %vm569_vm11, %v1444_v52, %v4585_v0  ;;  %v1447_v53 = vsel %vm569_vm11, %v4595_v17, %v1444_v52  ;;  %v1919_v31 = vsel %vm1061_vm9, %v4643_v47, %v4658_v55 }
 0x142   : > { %4023 = vmatprep.subr.msk.mxu1 %vm378_vm5, %v1264_v56 }
 0x144   : > { %4017 = vmatmul.mubr.msk.f32.vlgmr.msra.gmra.mxu1 %vm374_vm13, %v4014_v59  ;;  %v963_v60 = vpop.permute.xlu1 %962 }
 0x145   : > { %4024 = vmatpush1.msk.msra.mxu1 %vm378_vm5, %v1263_v58  ;;  %v966_v2 = vsel %vm552_vm8, %v961_v16, %v963_v60  ;;  %v967_v9 = vsel %vm552_vm8, %v963_v60, %v4583_v61  ;;  %1336 = vmatprep.mubr.f32.mxu1 %v4278_v1  ;;  %v4029_v16 = vld [vmem:[%s5090_s3 + $0x8] sm:$0xf] }
 0x146   : > { %4030 = vmatprep.subr.msk.mxu1 %vm378_vm5, %v1448_v54  ;;  %4011 = vmatprep.subr.msk.mxu0 %vm378_vm5, %v967_v9 }
 0x147   : > { %4012 = vmatpush1.msk.msra.mxu0 %vm378_vm5, %v966_v2 }
 0x148   : > { %4013 = vmatmul.mubr.msk.f32.vlgmr.msra.gmra.mxu0 %vm374_vm13, %v4010_v13  ;;  %4025 = vmatmul.mubr.msk.f32.vlgmr.msra.gmra.mxu1 %vm374_vm13, %v4022_v51  ;;  %v1162_v61 = vpop.permute.xlu1 %1161 }
 0x149   : > { %4031 = vmatpush1.msk.msra.mxu1 %vm378_vm5, %v1447_v53  ;;  %v1165_v0 = vsel %vm353_vm6, %v4597_v19, %v1162_v61  ;;  %v1166_v14 = vsel %vm353_vm6, %v1162_v61, %v4587_v3  ;;  %1238 = vmatprep.mubr.f32.mxu0 %v4278_v1  ;;  %v1723_v3 = vpop.permute.xlu0 %1722 }
 0x14a   : > { %4019 = vmatprep.subr.msk.mxu0 %vm378_vm5, %v1166_v14  ;;  %1520 = vmatprep.mubr.f32.mxu1 %v4278_v1  ;;  %v1727_v30 = vsel %vm657_vm7, %v1723_v3, %v4589_v4 }
 0x14b   : > { %4020 = vmatpush1.msk.msra.mxu0 %vm378_vm5, %v1165_v0  ;;  %4038 = vmatprep.subr.msk.mxu1 %vm378_vm5, %v4547_v20  ;;  %v4037_v20 = vld [vmem:[%s5090_s3 + $0x10] sm:$0xf] }
 0x14c   : > { %4021 = vmatmul.mubr.msk.f32.vlgmr.msra.gmra.mxu0 %vm374_vm13, %v4018_v15  ;;  %v1349_v17 = vpop.permute.xlu1 %1348  ;;  %4032 = vmatmul.mubr.msk.f32.vlgmr.msra.gmra.mxu1 %vm374_vm13, %v4029_v16 }
 0x14d   : > { %v1352_v19 = vsel %vm463_vm12, %v4599_v22, %v1349_v17  ;;  %v1353_v21 = vsel %vm463_vm12, %v1349_v17, %v4591_v7  ;;  %1425 = vmatprep.mubr.f32.mxu0 %v4278_v1  ;;  %4039 = vmatpush1.msk.msra.mxu1 %vm378_vm5, %v4403_v11  ;;  %v1913_v25 = vpop.permute.xlu0 %1912 }
 0x14e   : > { %4026 = vmatprep.subr.msk.mxu0 %vm378_vm5, %v1353_v21  ;;  %1702 = vmatprep.mubr.f32.mxu1 %v4278_v1  ;;  %v1918_v35 = vsel %vm1061_vm9, %v1913_v25, %v4643_v47  ;;  %v4290_v47 = vmov 4  }
 0x14f   : > { %4027 = vmatpush1.msk.msra.mxu0 %vm378_vm5, %v1352_v19  ;;  %4196 = vset.pattern.permute.xlu1 %v4290_v47 }
 0x150   : > { %4028 = vmatmul.mubr.msk.f32.vlgmr.msra.gmra.mxu0 %vm374_vm13, %v1251_v23  ;;  %v1541_v7 = vpop.permute.xlu1 %1540  ;;  %4040 = vmatmul.mubr.msk.f32.vlgmr.msra.gmra.mxu1 %vm374_vm13, %v4037_v20 }
 0x151   : > { %v1544_v22 = vsel %vm674_vm10, %v4610_v29, %v1541_v7  ;;  %v1545_v11 = vsel %vm674_vm10, %v1541_v7, %v4593_v8  ;;  %1617 = vmatprep.mubr.f32.mxu0 %v4278_v1  ;;  %1896 = vmatprep.mubr.f32.mxu1 %v4278_v1  ;;  %v1726_v29 = vsel %vm657_vm7, %v4608_v27, %v1723_v3  ;;  %v4041_v27 = vld [vmem:[%s5090_s3 + $0x14] sm:$0xf]  ;;  %v2014_v37 = vpop.permute.xlu0 %2013 }
 0x152   : > { %4034 = vmatprep.subr.msk.mxu0 %vm378_vm5, %v1545_v11 }
 0x153   : > { %4035 = vmatpush1.msk.msra.mxu0 %vm378_vm5, %v1544_v22 }
 0x154   : > { %4036 = vmatmul.mubr.msk.f32.vlgmr.msra.gmra.mxu0 %vm374_vm13, %v4033_v24  ;;  %4042 = vmatprep.subr.msk.mxu0 %vm378_vm5, %v1727_v30  ;;  %v1820_v8 = vpop.permute.xlu1 %1819 }
 0x155   : > { %v1823_v32 = vsel %vm552_vm8, %v4647_v48, %v1820_v8  ;;  %v1824_v4 = vsel %vm552_vm8, %v1820_v8, %v4630_v38  ;;  %4043 = vmatpush1.msk.msra.mxu0 %vm378_vm5, %v1726_v29  ;;  %1799 = vmatprep.mubr.f32.mxu0 %v4278_v1  ;;  %v4291_v48 = vmov 3  }
 0x156   : > { %4046 = vmatprep.subr.msk.mxu1 %vm378_vm5, %v1824_v4  ;;  %4050 = vmatprep.subr.msk.mxu0 %vm378_vm5, %v1919_v31 }
 0x157   : > { %4047 = vmatpush1.msk.msra.mxu1 %vm378_vm5, %v1823_v32  ;;  %4195 = vset.pattern.permute.xlu0 %v4291_v48 }
 0x158   : > { %4044 = vmatmul.mubr.msk.f32.vlgmr.msra.gmra.mxu0 %vm374_vm13, %v4041_v27  ;;  %v2012_v38 = vpop.permute.xlu1 %2011  ;;  %4048 = vmatmul.mubr.msk.f32.vlgmr.msra.gmra.mxu1 %vm374_vm13, %v4045_v34 }
 0x159   : > { %4051 = vmatpush1.msk.msra.mxu0 %vm378_vm5, %v1918_v35  ;;  %v2016_v39 = vsel %vm353_vm6, %v2012_v38, %v2014_v37  ;;  %1991 = vmatprep.mubr.f32.mxu0 %v4278_v1 }
 0x15a   : > { %4054 = vmatprep.subr.msk.mxu1 %vm378_vm5, %v2016_v39  ;;  %2088 = vmatprep.mubr.f32.mxu1 %v4278_v1 }
 0x15c   : > { %4052 = vmatmul.mubr.msk.f32.vlgmr.msra.gmra.mxu0 %vm374_vm13, %v4049_v40  ;;  %v2010_v43 = vpop.permute.xlu1 %2009 }
 0x15d   : > { %v2015_v45 = vsel %vm353_vm6, %v2010_v43, %v2012_v38  ;;  %2219 = vmatprep.mubr.f32.mxu0 %v4278_v1 }
 0x15e   : > { %4055 = vmatpush1.msk.msra.mxu1 %vm378_vm5, %v2015_v45 }
 0x15f   : > { %4056 = vmatmul.mubr.msk.f32.vlgmr.msra.gmra.mxu1 %vm374_vm13, %v4053_v44 }
 0x160   : > { %2308 = vmatprep.mubr.f32.mxu1 %v4278_v1 }
 0x165   : > { %v449_v49 = vpop.f32.mrf.mxu0 }
 0x167   : > { %v451_v50 = vpop.f32.mrf.mxu0 }
 0x1f0   : > { %v645_v59 = vpop.f32.mrf.mxu0 }
 0x1f2   : > { %v647_v58 = vpop.f32.mrf.mxu0 }
 0x1f4   : > { %v835_v2 = vpop.f32.mrf.mxu0 }
 0x1f6   : > { %v837_v53 = vpop.f32.mrf.mxu0 }
 0x1f8   : > { %v539_v55 = vpop.f32.mrf.mxu1 }
 0x1f9   : > { %v540_v13 = vadd.f32 %v539_v55, %v449_v49 }
 0x1fa   : > { %v541_v56 = vpop.f32.mrf.mxu1 }
 0x1fb   : > { %v542_v0 = vadd.f32 %v541_v56, %v451_v50  ;;  %v650_v14 = vadd.f32 %v645_v59, %v540_v13 }
 0x1fc   : > { %v750_v52 = vpop.f32.mrf.mxu1 }
 0x1fd   : > { %v651_v19 = vadd.f32 %v647_v58, %v542_v0  ;;  %v755_v21 = vadd.f32 %v750_v52, %v650_v14 }
 0x1fe   : > { %v752_v60 = vpop.f32.mrf.mxu1 }
 0x1ff   : > { %v756_v11 = vadd.f32 %v752_v60, %v651_v19  ;;  %v840_v24 = vadd.f32 %v835_v2, %v755_v21 }
 0x200   : > { %v938_v54 = vpop.f32.mrf.mxu1 }
 0x201   : > { %v841_v4 = vadd.f32 %v837_v53, %v756_v11  ;;  %v943_v27 = vadd.f32 %v938_v54, %v840_v24  ;;  %v2114_v11 = vpop.permute.xlu1 %2113 }
 0x202   : > { %v940_v9 = vpop.f32.mrf.mxu1 }
 0x203   : > { %v944_v44 = vadd.f32 %v940_v9, %v841_v4 }
 0x204   : > { %v1137_v51 = vpop.f32.mrf.mxu1 }
 0x206   : > { %v1139_v61 = vpop.f32.mrf.mxu1 }
 0x208   : > { %v1041_v15 = vpop.f32.mrf.mxu0  ;;  %v1338_v16 = vpop.f32.mrf.mxu1 }
 0x209   : > { %v1046_v45 = vadd.f32 %v1041_v15, %v943_v27 }
 0x20a   : > { %v1043_v3 = vpop.f32.mrf.mxu0  ;;  %v1340_v17 = vpop.f32.mrf.mxu1 }
 0x20b   : > { %v1047_v50 = vadd.f32 %v1043_v3, %v944_v44  ;;  %v1142_v58 = vadd.f32 %v1137_v51, %v1046_v45 }
 0x20c   : > { %v1240_v23 = vpop.f32.mrf.mxu0  ;;  %v1522_v20 = vpop.f32.mrf.mxu1 }
 0x20d   : > { %v1143_v13 = vadd.f32 %v1139_v61, %v1047_v50 }
 0x20e   : > { %v1242_v7 = vpop.f32.mrf.mxu0  ;;  %v1524_v22 = vpop.f32.mrf.mxu1 }
 0x210   : > { %v1427_v25 = vpop.f32.mrf.mxu0  ;;  %v1704_v30 = vpop.f32.mrf.mxu1 }
 0x211   : > { %v1428_v29 = vadd.f32 %v1427_v25, %v1338_v16  ;;  %v1245_v16 = vadd.f32 %v1240_v23, %v1142_v58 }
 0x212   : > { %v1429_v8 = vpop.f32.mrf.mxu0  ;;  %v1706_v35 = vpop.f32.mrf.mxu1 }
 0x213   : > { %v1527_v31 = vadd.f32 %v1522_v20, %v1428_v29  ;;  %v1430_v32 = vadd.f32 %v1429_v8, %v1340_v17  ;;  %v1246_v17 = vadd.f32 %v1242_v7, %v1143_v13  ;;  %v2102_v20 = vpop.permute.xlu0 %2101  ;;  %v3563_v13 = vld [vmem:[#allocation2 + $0xc] sm:$0xf] }
 0x214   : > { %v1619_v34 = vpop.f32.mrf.mxu0 }
 0x215   : > { %v1528_v37 = vadd.f32 %v1524_v22, %v1430_v32  ;;  %v1624_v38 = vadd.f32 %v1619_v34, %v1527_v31  ;;  %v2120_v31 = vpop.permute.xlu1 %2119 }
 0x216   : > { %v1621_v39 = vpop.f32.mrf.mxu0 }
 0x217   : > { %v1709_v40 = vadd.f32 %v1704_v30, %v1624_v38  ;;  %v1625_v43 = vadd.f32 %v1621_v39, %v1528_v37 }
 0x218   : > { %v1801_v46 = vpop.f32.mrf.mxu0  ;;  %v1898_v47 = vpop.f32.mrf.mxu1 }
 0x219   : > { %v1710_v48 = vadd.f32 %v1706_v35, %v1625_v43  ;;  %v1806_v49 = vadd.f32 %v1801_v46, %v1709_v40 }
 0x21a   : > { %v1803_v55 = vpop.f32.mrf.mxu0  ;;  %v1900_v56 = vpop.f32.mrf.mxu1 }
 0x21b   : > { %v1903_v59 = vadd.f32 %v1898_v47, %v1806_v49  ;;  %v1807_v52 = vadd.f32 %v1803_v55, %v1710_v48 }
 0x21c   : > { %v1993_v60 = vpop.f32.mrf.mxu0 }
 0x21d   : > { %v1904_v54 = vadd.f32 %v1900_v56, %v1807_v52  ;;  %v1998_v2 = vadd.f32 %v1993_v60, %v1903_v59  ;;  %v2884_v60 = vld [vmem:[#allocation2 + $0xc] sm:$0xf] }
 0x21e   : > { %v1995_v53 = vpop.f32.mrf.mxu0 }
 0x21f   : > { %v1999_v0 = vadd.f32 %v1995_v53, %v1904_v54  ;;  %v2090_v14 = vpop.f32.mrf.mxu1  ;;  %v2129_v54 = vld [vmem:[%s5093_s6] sm:$0xf]  ;;  %v3565_v53 = vmul.f32 %v3563_v13, %v4450_v41  ;;  %v4057_v41 = vld [vmem:[%s5091_s4 + $0x4] sm:$0xf] }
 0x220   : > { %v2095_v9 = vadd.f32 %v2090_v14, %v1998_v2  ;;  %v2886_v2 = vmul.f32 %v2884_v60, %v4454_v42  ;;  %v4080_v60 = vld [vmem:[%s5091_s4 + $0x18] sm:$0xf] }
 0x221   : > { %v2092_v15 = vpop.f32.mrf.mxu1 }
 0x222   : > { %v2097_v19 = vadd.f32 %v2095_v9, %v1245_v16  ;;  %v2096_v21 = vadd.f32 %v2092_v15, %v1999_v0  ;;  %v3466_v0 = vld [vmem:[#allocation2 + $0xc] sm:$0xf]  ;;  %v2608_v16 = vpop.permute.xlu1 %2607  ;;  %v2705_v15 = vpop.permute.xlu0 %2704 }
 0x223   : > { %v3468_v14 = vmul.f32 %v3466_v0, %v4447_v36  ;;  %v4088_v0 = vld [vmem:[%s5091_s4 + $0x20] sm:$0xf] }
 0x224   : > { %v2104_v3 = vadd.f32 %v2102_v20, %v2097_v19  ;;  %v2098_v22 = vadd.f32 %v2096_v21, %v1246_v17 }
 0x226   : > { %vm2106_vm14 = vcmp.ge.f32.partialorder %v2104_v3, 0.0  ;;  %v2108_v24 = vmul.f32 0.01, %v2104_v3  ;;  %v2105_v51 = vadd.f32 %v2102_v20, %v2098_v22  ;;  %v2800_v9 = vpop.permute.xlu1 %2799 }
 0x228   : > { %v2110_v25 = vsel %vm2106_vm14, %v2104_v3, %v2108_v24  ;;  %vm2107_vm15 = vcmp.ge.f32.partialorder %v2105_v51, 0.0  ;;  %v2109_v30 = vmul.f32 0.01, %v2105_v51 }
 0x229   : > { %v2116_v61 = vmul.f32 %v2114_v11, %v2110_v25 }
 0x22a   : > { %v2111_v29 = vsel %vm2107_vm15, %v2105_v51, %v2109_v30 }
 0x22b   : > { %v2117_v8 = vmul.f32 %v2114_v11, %v2111_v29  ;;  %v4788_v23 = vadd.f32 %v2120_v31, %v2116_v61 }
 0x22d   : > { %v4790_v32 = vadd.f32 %v2120_v31, %v2117_v8 }
 0x22f   : > { %v4794_v7 = vcombine.low %v4788_v23, %v4790_v32  ;;  %v4821_v49 = vcombine.low %v4790_v32, %v4790_v32 }
 0x231   : > { %2128 = vst [vmem:[#allocation2 + $0x4] sm:$0xff] %v4794_v7  ;;  %v2693_v46 = vmul.f32 %v4794_v7, %v4505_v6  ;;  %v2596_v47 = vmul.f32 %v4794_v7, %v4501_v5  ;;  %v2885_v59 = vmul.f32 %v4794_v7, %v4520_v12 }
 0x233   : > { %v2699_v56 = vcombine.high %v2693_v46, %v2693_v46  ;;  %v2602_v52 = vcombine.high %v2596_v47, %v2596_v47  ;;  %v2891_v58 = vcombine.high %v2885_v59, %v2885_v59 }
 0x238   : > { %v2131_v4 = vld [vmem:[#allocation2 + $0x8] sm:$0xf]  ;;  %v2130_v27 = vld [vmem:[#allocation2] sm:$0xff] }
 0x239   : > { %2144 = vrot.lane.b32.xlu1 %v2131_v4, %s4285_s13  ;;  %2140 = vrot.lane.b32.xlu0 %v2130_v27, %s4285_s13  ;;  %v2139_v34 = vcombine.high %v2130_v27, %v2130_v27  ;;  %v2132_v35 = vmul.f32 %v2130_v27, %v4472_v57  ;;  %v2316_v37 = vld [vmem:[#allocation2 + $0x8] sm:$0xf]  ;;  %v2133_v38 = vmul.f32 %v2131_v4, %v4438_v26  ;;  %v2134_v4 = vld [vmem:[%s5091_s4] sm:$0xf] }
 0x23a   : > { %v2318_v39 = vmul.f32 %v2316_v37, %v4443_v33  ;;  %v2317_v40 = vmul.f32 %v2130_v27, %v4487_v63  ;;  %v2414_v43 = vmul.f32 %v2130_v27, %v4483_v62  ;;  %v2413_v44 = vld [vmem:[#allocation2 + $0x8] sm:$0xf] }
 0x23b   : > { %v2415_v45 = vmul.f32 %v2413_v44, %v4440_v28  ;;  %v2228_v48 = vcombine.high %v2132_v35, %v2132_v35 }
 0x23c   : > { %v2420_v50 = vcombine.high %v2414_v43, %v2414_v43  ;;  %v2323_v55 = vcombine.high %v2317_v40, %v2317_v40 }
 0x23d   : > { %2142 = vrot.lane.b32.xlu0 %v2139_v34, %s4285_s13  ;;  %2229 = vrot.lane.b32.xlu1 %v2132_v35, %s4284_s9 }
 0x241   : > { %2233 = vrot.lane.b32.xlu0 %v2133_v38, %s4284_s9  ;;  %2328 = vrot.lane.b32.xlu1 %v2318_v39, %s4283_s8  ;;  %v4068_v38 = vld [vmem:[%s5091_s4 + $0xc] sm:$0xf] }
 0x245   : > { %2324 = vrot.lane.b32.xlu0 %v2317_v40, %s4283_s8  ;;  %2421 = vrot.lane.b32.xlu1 %v2414_v43, %s4282_s29 }
 0x249   : > { %2425 = vrot.lane.b32.xlu0 %v2415_v45, %s4282_s29  ;;  %2700 = vrot.lane.b32.xlu1 %v2693_v46, %s4281_s23  ;;  %v4064_v45 = vld [vmem:[%s5091_s4 + $0x8] sm:$0xf] }
 0x24d   : > { %2603 = vrot.lane.b32.xlu0 %v2596_v47, %s4280_s22  ;;  %2231 = vrot.lane.b32.xlu1 %v2228_v48, %s4284_s9 }
 0x251   : > { %2797 = vrot.lane.b32.xlu0 %v4821_v49, %s4286_s14  ;;  %2423 = vrot.lane.b32.xlu1 %v2420_v50, %s4282_s29 }
 0x255   : > { %2326 = vrot.lane.b32.xlu0 %v2323_v55, %s4283_s8  ;;  %2702 = vrot.lane.b32.xlu1 %v2699_v56, %s4281_s23  ;;  %v4072_v56 = vld [vmem:[%s5091_s4 + $0x10] sm:$0xf] }
 0x259   : > { %2605 = vrot.lane.b32.xlu0 %v2602_v52, %s4280_s22  ;;  %2894 = vrot.lane.b32.xlu1 %v2891_v58, %s4279_s21 }
 0x25d   : > { %2795 = vrot.lane.b32.xlu0 %v4794_v7, %s4286_s14  ;;  %2892 = vrot.lane.b32.xlu1 %v2885_v59, %s4279_s21 }
 0x261   : > { %2896 = vrot.lane.b32.xlu0 %v2886_v2, %s4279_s21  ;;  %2988 = vperm.xlu1 %4196, %v2129_v54  }
 0x265   : > { %2982 = vperm.xlu0 %4195, %v2129_v54   ;;  %3575 = vrot.lane.b32.xlu1 %v3565_v53, %s4281_s23  ;;  %v4084_v54 = vld [vmem:[%s5091_s4 + $0x1c] sm:$0xf] }
 0x269   : > { %3478 = vrot.lane.b32.xlu0 %v3468_v14, %s4280_s22 }
 0x2ab   : > { %v2141_v17 = vpop.permute.xlu0 %2140  ;;  %v2145_v19 = vpop.permute.xlu1 %2144 }
 0x2af   : > { %v2143_v21 = vpop.permute.xlu0 %2142  ;;  %v2230_v20 = vpop.permute.xlu1 %2229 }
 0x2b0   : > { %v2146_v3 = vsel %vm371_vm4, %v2141_v17, %v2143_v21  ;;  %v2147_v22 = vsel %vm371_vm4, %v2143_v21, %v2145_v19 }
 0x2b1   : > { %4058 = vmatprep.subr.msk.mxu0 %vm378_vm5, %v2147_v22 }
 0x2b2   : > { %4059 = vmatpush1.msk.msra.mxu0 %vm378_vm5, %v2146_v3 }
 0x2b3   : > { %v2234_v36 = vpop.permute.xlu0 %2233  ;;  %v2329_v11 = vpop.permute.xlu1 %2328  ;;  %4060 = vmatmul.mubr.msk.f32.vlgmr.msra.gmra.mxu0 %vm374_vm13, %v4057_v41 }
 0x2b4   : > { %2403 = vmatprep.mubr.f32.mxu0 %v4278_v1 }
 0x2b7   : > { %v2325_v24 = vpop.permute.xlu0 %2324  ;;  %v2422_v51 = vpop.permute.xlu1 %2421 }
 0x2bb   : > { %v2426_v25 = vpop.permute.xlu0 %2425  ;;  %v2701_v30 = vpop.permute.xlu1 %2700 }
 0x2bf   : > { %v2604_v61 = vpop.permute.xlu0 %2603  ;;  %v2232_v29 = vpop.permute.xlu1 %2231 }
 0x2c0   : > { %v2235_v8 = vsel %vm463_vm12, %v2230_v20, %v2232_v29  ;;  %v2236_v31 = vsel %vm463_vm12, %v2232_v29, %v2234_v36 }
 0x2c1   : > { %4061 = vmatprep.subr.msk.mxu1 %vm378_vm5, %v2236_v31 }
 0x2c2   : > { %4062 = vmatpush1.msk.msra.mxu1 %vm378_vm5, %v2235_v8 }
 0x2c3   : > { %v2798_v27 = vpop.permute.xlu0 %2797  ;;  %v2424_v34 = vpop.permute.xlu1 %2423  ;;  %4063 = vmatmul.mubr.msk.f32.vlgmr.msra.gmra.mxu1 %vm374_vm13, %v2134_v4 }
 0x2c4   : > { %v2427_v35 = vsel %vm674_vm10, %v2422_v51, %v2424_v34  ;;  %v2428_v37 = vsel %vm674_vm10, %v2424_v34, %v2426_v25  ;;  %2500 = vmatprep.mubr.f32.mxu1 %v4278_v1  ;;  %v2802_v59 = vsel %vm1061_vm9, %v2798_v27, %v2800_v9 }
 0x2c5   : > { %4069 = vmatprep.subr.msk.mxu1 %vm378_vm5, %v2428_v37 }
 0x2c6   : > { %4070 = vmatpush1.msk.msra.mxu1 %vm378_vm5, %v2427_v35 }
 0x2c7   : > { %v2327_v39 = vpop.permute.xlu0 %2326  ;;  %v2703_v40 = vpop.permute.xlu1 %2702  ;;  %4071 = vmatmul.mubr.msk.f32.vlgmr.msra.gmra.mxu1 %vm374_vm13, %v4068_v38 }
 0x2c8   : > { %v2330_v43 = vsel %vm569_vm11, %v2325_v24, %v2327_v39  ;;  %v2331_v44 = vsel %vm569_vm11, %v2327_v39, %v2329_v11  ;;  %2682 = vmatprep.mubr.f32.mxu1 %v4278_v1  ;;  %v2707_v47 = vsel %vm552_vm8, %v2703_v40, %v2705_v15 }
 0x2c9   : > { %4065 = vmatprep.subr.msk.mxu0 %vm378_vm5, %v2331_v44 }
 0x2ca   : > { %4066 = vmatpush1.msk.msra.mxu0 %vm378_vm5, %v2330_v43 }
 0x2cb   : > { %v2606_v46 = vpop.permute.xlu0 %2605  ;;  %4067 = vmatmul.mubr.msk.f32.vlgmr.msra.gmra.mxu0 %vm374_vm13, %v4064_v45  ;;  %4073 = vmatprep.subr.msk.mxu0 %vm378_vm5, %v4821_v49  ;;  %v2895_v55 = vpop.permute.xlu1 %2894  ;;  %v4076_v49 = vld [vmem:[%s5091_s4 + $0x14] sm:$0xf] }
 0x2cc   : > { %v2609_v48 = vsel %vm657_vm7, %v2604_v61, %v2606_v46  ;;  %v2610_v50 = vsel %vm657_vm7, %v2606_v46, %v2608_v16  ;;  %4074 = vmatpush1.msk.msra.mxu0 %vm378_vm5, %v4794_v7  ;;  %2585 = vmatprep.mubr.f32.mxu0 %v4278_v1  ;;  %v2706_v7 = vsel %vm552_vm8, %v2701_v30, %v2703_v40  ;;  %v3660_v16 = vld [vmem:[#allocation2 + $0xc] sm:$0xf] }
 0x2cd   : > { %4077 = vmatprep.subr.msk.mxu1 %vm378_vm5, %v2610_v50  ;;  %4081 = vmatprep.subr.msk.mxu0 %vm378_vm5, %v2707_v47 }
 0x2ce   : > { %4078 = vmatpush1.msk.msra.mxu1 %vm378_vm5, %v2609_v48  ;;  %3670 = vrot.lane.b32.xlu0 %v3660_v16, %s4286_s14 }
 0x2cf   : > { %v2796_v52 = vpop.permute.xlu0 %2795  ;;  %4075 = vmatmul.mubr.msk.f32.vlgmr.msra.gmra.mxu0 %vm374_vm13, %v4072_v56  ;;  %4079 = vmatmul.mubr.msk.f32.vlgmr.msra.gmra.mxu1 %vm374_vm13, %v4076_v49  ;;  %v2893_v2 = vpop.permute.xlu1 %2892 }
 0x2d0   : > { %v2801_v58 = vsel %vm1061_vm9, %v2796_v52, %v2798_v27  ;;  %4082 = vmatpush1.msk.msra.mxu0 %vm378_vm5, %v2706_v7  ;;  %4085 = vmatprep.subr.msk.mxu1 %vm378_vm5, %v2802_v59  ;;  %v2898_v14 = vsel %vm353_vm6, %v2893_v2, %v2895_v55 }
 0x2d1   : > { %4086 = vmatpush1.msk.msra.mxu1 %vm378_vm5, %v2801_v58  ;;  %2779 = vmatprep.mubr.f32.mxu0 %v4278_v1 }
 0x2d2   : > { %2874 = vmatprep.mubr.f32.mxu1 %v4278_v1 }
 0x2d3   : > { %v2897_v13 = vpop.permute.xlu0 %2896  ;;  %4083 = vmatmul.mubr.msk.f32.vlgmr.msra.gmra.mxu0 %vm374_vm13, %v4080_v60  ;;  %4087 = vmatmul.mubr.msk.f32.vlgmr.msra.gmra.mxu1 %vm374_vm13, %v4084_v54 }
 0x2d4   : > { %v2899_v53 = vsel %vm353_vm6, %v2895_v55, %v2897_v13  ;;  %2971 = vmatprep.mubr.f32.mxu0 %v4278_v1  ;;  %3090 = vmatprep.mubr.f32.mxu1 %v4278_v1 }
 0x2d5   : > { %4089 = vmatprep.subr.msk.mxu0 %vm378_vm5, %v2899_v53 }
 0x2d6   : > { %4090 = vmatpush1.msk.msra.mxu0 %vm378_vm5, %v2898_v14 }
 0x2d7   : > { %4091 = vmatmul.mubr.msk.f32.vlgmr.msra.gmra.mxu0 %vm374_vm13, %v4088_v0 }
 0x2d8   : > { %3179 = vmatprep.mubr.f32.mxu0 %v4278_v1 }
 0x2dc   : > { %v2989_v49 = vpop.permute.xlu1 %2988 }
 0x2e0   : > { %v2983_v48 = vpop.permute.xlu0 %2982 }
 0x373   : > { %v2221_v15 = vpop.f32.mrf.mxu0 }
 0x375   : > { %v2223_v21 = vpop.f32.mrf.mxu0 }
 0x383   : > { %v2310_v9 = vpop.f32.mrf.mxu1 }
 0x384   : > { %v2311_v20 = vadd.f32 %v2310_v9, %v2221_v15 }
 0x385   : > { %v2312_v17 = vpop.f32.mrf.mxu1 }
 0x386   : > { %v2313_v41 = vadd.f32 %v2312_v17, %v2223_v21 }
 0x387   : > { %v2502_v19 = vpop.f32.mrf.mxu1 }
 0x389   : > { %v2504_v22 = vpop.f32.mrf.mxu1 }
 0x38b   : > { %v2405_v3 = vpop.f32.mrf.mxu0 }
 0x38c   : > { %v2410_v36 = vadd.f32 %v2405_v3, %v2311_v20 }
 0x38d   : > { %v2407_v11 = vpop.f32.mrf.mxu0 }
 0x38e   : > { %v2507_v24 = vadd.f32 %v2502_v19, %v2410_v36  ;;  %v2411_v51 = vadd.f32 %v2407_v11, %v2313_v41  ;;  %v4293_v41 = vmov 6   ;;  %v3755_v36 = vld [vmem:[#allocation2 + $0xc] sm:$0xf]  ;;  %v3000_v11 = vld [vmem:[%s5093_s6] sm:$0xf] }
 0x38f   : > { %v2587_v25 = vpop.f32.mrf.mxu0  ;;  %v2684_v30 = vpop.f32.mrf.mxu1  ;;  %4198 = vset.pattern.permute.xlu0 %v4293_v41 }
 0x390   : > { %v2508_v61 = vadd.f32 %v2504_v22, %v2411_v51  ;;  %v2592_v29 = vadd.f32 %v2587_v25, %v2507_v24  ;;  %v4292_v22 = vmov 5   ;;  %v3479_v24 = vpop.permute.xlu0 %3478  ;;  %v3576_v25 = vpop.permute.xlu1 %3575 }
 0x391   : > { %v2589_v8 = vpop.f32.mrf.mxu0  ;;  %v2686_v31 = vpop.f32.mrf.mxu1  ;;  %4197 = vset.pattern.permute.xlu1 %v4292_v22 }
 0x392   : > { %v2689_v4 = vadd.f32 %v2684_v30, %v2592_v29  ;;  %v2593_v27 = vadd.f32 %v2589_v8, %v2508_v61 }
 0x393   : > { %v2781_v34 = vpop.f32.mrf.mxu0  ;;  %v2876_v35 = vpop.f32.mrf.mxu1 }
 0x394   : > { %v2690_v37 = vadd.f32 %v2686_v31, %v2593_v27  ;;  %v2786_v38 = vadd.f32 %v2781_v34, %v2689_v4  ;;  %v3671_v51 = vpop.permute.xlu0 %3670 }
 0x395   : > { %v2783_v39 = vpop.f32.mrf.mxu0  ;;  %v2878_v44 = vpop.f32.mrf.mxu1 }
 0x396   : > { %v2881_v40 = vadd.f32 %v2876_v35, %v2786_v38  ;;  %v2787_v43 = vadd.f32 %v2783_v39, %v2690_v37 }
 0x397   : > { %v2973_v45 = vpop.f32.mrf.mxu0 }
 0x398   : > { %v2882_v46 = vadd.f32 %v2878_v44, %v2787_v43  ;;  %v2978_v47 = vadd.f32 %v2973_v45, %v2881_v40 }
 0x399   : > { %v2975_v50 = vpop.f32.mrf.mxu0 }
 0x39a   : > { %v2985_v55 = vmul.f32 %v2983_v48, %v2978_v47  ;;  %v2979_v56 = vadd.f32 %v2975_v50, %v2882_v46  ;;  %v3005_v46 = vld [vmem:[%s5092_s5] sm:$0xf] }
 0x39c   : > { %v2991_v59 = vadd.f32 %v2989_v49, %v2985_v55  ;;  %v2986_v7 = vmul.f32 %v2983_v48, %v2979_v56  ;;  %v4103_v56 = vld [vmem:[%s5092_s5 + $0xc] sm:$0xf] }
 0x39e   : > { %v2992_v52 = vadd.f32 %v2989_v49, %v2986_v7  ;;  %v2993_v58 = vmax.f32 %v2991_v59, 0.0 }
 0x3a0   : > { %v2994_v60 = vmax.f32 %v2992_v52, 0.0 }
 0x3a2   : > { %v4926_v54 = vcombine.low %v2993_v58, %v2994_v60  ;;  %v4951_v21 = vcombine.low %v2994_v60, %v2994_v60  ;;  %v4099_v58 = vld [vmem:[%s5092_s5 + $0x8] sm:$0xf] }
 0x3a4   : > { %2999 = vst [vmem:[#allocation2 + $0x4] sm:$0xff] %v4926_v54  ;;  %v3756_v20 = vmul.f32 %v4926_v54, %v4520_v12  ;;  %v3757_v12 = vmul.f32 %v3755_v36, %v4454_v42  ;;  %v4092_v42 = vld [vmem:[%s5092_s5 + $0x4] sm:$0xf] }
 0x3a6   : > { %v3762_v3 = vcombine.high %v3756_v20, %v3756_v20 }
 0x3ab   : > { %v3002_v2 = vld [vmem:[#allocation2 + $0x8] sm:$0xf]  ;;  %v3001_v13 = vld [vmem:[#allocation2] sm:$0xff] }
 0x3ac   : > { %3015 = vrot.lane.b32.xlu0 %v3002_v2, %s4285_s13  ;;  %3011 = vrot.lane.b32.xlu1 %v3001_v13, %s4285_s13  ;;  %v3010_v53 = vcombine.high %v3001_v13, %v3001_v13  ;;  %v3003_v0 = vmul.f32 %v3001_v13, %v4472_v57  ;;  %v3187_v14 = vld [vmem:[#allocation2 + $0x8] sm:$0xf]  ;;  %v3004_v16 = vmul.f32 %v3002_v2, %v4438_v26 }
 0x3ad   : > { %v3189_v9 = vmul.f32 %v3187_v14, %v4443_v33  ;;  %v3188_v15 = vmul.f32 %v3001_v13, %v4487_v63  ;;  %v3285_v17 = vmul.f32 %v3001_v13, %v4483_v62  ;;  %v3284_v19 = vld [vmem:[#allocation2 + $0x8] sm:$0xf]  ;;  %v3564_v26 = vmul.f32 %v4926_v54, %v4505_v6  ;;  %v4107_v14 = vld [vmem:[%s5092_s5 + $0x10] sm:$0xf] }
 0x3ae   : > { %v3286_v57 = vmul.f32 %v3284_v19, %v4440_v28  ;;  %v3467_v33 = vmul.f32 %v4926_v54, %v4501_v5  ;;  %v3099_v63 = vcombine.high %v3003_v0, %v3003_v0  ;;  %v4115_v19 = vld [vmem:[%s5092_s5 + $0x18] sm:$0xf] }
 0x3af   : > { %v3291_v62 = vcombine.high %v3285_v17, %v3285_v17  ;;  %v3194_v28 = vcombine.high %v3188_v15, %v3188_v15  ;;  %v3570_v6 = vcombine.high %v3564_v26, %v3564_v26 }
 0x3b0   : > { %3013 = vrot.lane.b32.xlu1 %v3010_v53, %s4285_s13  ;;  %3100 = vrot.lane.b32.xlu0 %v3003_v0, %s4284_s9  ;;  %v3473_v5 = vcombine.high %v3467_v33, %v3467_v33  ;;  %s284_s13 = sand.u32 1, %s4268_s25  }
 0x3b4   : > { %3104 = vrot.lane.b32.xlu1 %v3004_v16, %s4284_s9  ;;  %3199 = vrot.lane.b32.xlu0 %v3189_v9, %s4283_s8  ;;  %v4111_v16 = vld [vmem:[%s5092_s5 + $0x14] sm:$0xf] }
 0x3b8   : > { %3195 = vrot.lane.b32.xlu1 %v3188_v15, %s4283_s8  ;;  %3292 = vrot.lane.b32.xlu0 %v3285_v17, %s4282_s29 }
 0x3bc   : > { %3296 = vrot.lane.b32.xlu1 %v3286_v57, %s4282_s29  ;;  %3571 = vrot.lane.b32.xlu0 %v3564_v26, %s4281_s23  ;;  %v4119_v57 = vld [vmem:[%s5092_s5 + $0x1c] sm:$0xf] }
 0x3c0   : > { %3474 = vrot.lane.b32.xlu1 %v3467_v33, %s4280_s22  ;;  %3102 = vrot.lane.b32.xlu0 %v3099_v63, %s4284_s9 }
 0x3c4   : > { %3668 = vrot.lane.b32.xlu1 %v4951_v21, %s4286_s14  ;;  %3294 = vrot.lane.b32.xlu0 %v3291_v62, %s4282_s29  ;;  %v4123_v62 = vld [vmem:[%s5092_s5 + $0x20] sm:$0xf]  ;;  %s3889_s29 = scalar_lea.sflag [#allocation5], %s284_s13 }
 0x3c8   : > { %3197 = vrot.lane.b32.xlu1 %v3194_v28, %s4283_s8  ;;  %3573 = vrot.lane.b32.xlu0 %v3570_v6, %s4281_s23 }
 0x3cc   : > { %3476 = vrot.lane.b32.xlu1 %v3473_v5, %s4280_s22  ;;  %3765 = vrot.lane.b32.xlu0 %v3762_v3, %s4279_s21  ;;  %s4220_s22 = sshll.u32 %s4294_s28, 4  ;;  %s4221_s22 = int_to_ptr.vmem [resolvable:$false] %s4220_s22 }
 0x3cd   : > { %s4222_s8 = scalar_lea.vmem %s4221_s22, 256 }
 0x3d0   : > { %3666 = vrot.lane.b32.xlu1 %v4926_v54, %s4286_s14  ;;  %3763 = vrot.lane.b32.xlu0 %v3756_v20, %s4279_s21  ;;  %s3978_s14 = sshll.u32 %s284_s13, 3 }
 0x3d1   : > { %s286_s20 = scalar_lea.vmem [#allocation4], %s3978_s14 }
 0x3d2   : > { %s3903_s15 = sshll.u32 %s286_s20, 4  ;;  %s3904_s15 = int_to_ptr.vmem [resolvable:$true] %s3903_s15 }
 0x3d3   : > { %s4216_s23 = scalar_lea.vmem %s3904_s15, 128  ;;  %p4223_p0 = scmp.lt.s32.totalorder %s3904_s15, %s4221_s22 }
 0x3d4   : > { %3767 = vrot.lane.b32.xlu1 %v3757_v12, %s4279_s21  ;;  %3859 = vperm.xlu0 %4198, %v3000_v11   ;;  %p4217_p11 = scmp.ne.s32.totalorder %s3904_s15, %s4216_s23  ;;  %p4224_p1 = scmp.lt.s32.totalorder %s4222_s8, %s4216_s23 }
 0x3d6   : > { %p4218_p12 = pnand %p4217_p11, %p4373_p5  ;;  %p4225_p2 = por %p4224_p1, %p4223_p0 }
 0x3d8   : > { %3853 = vperm.xlu1 %4197, %v3000_v11   ;;  %p4219_p13 = pneg %p4218_p12 }
 0x3da   : > { %p4226_p3 = pnand %p4225_p2, %p4219_p13 }
 0x41e   : > { %v3016_v30 = vpop.permute.xlu0 %3015  ;;  %v3012_v61 = vpop.permute.xlu1 %3011 }
 0x422   : > { %v3101_v29 = vpop.permute.xlu0 %3100  ;;  %v3014_v8 = vpop.permute.xlu1 %3013 }
 0x423   : > { %v3017_v31 = vsel %vm371_vm4, %v3012_v61, %v3014_v8  ;;  %v3018_v4 = vsel %vm371_vm4, %v3014_v8, %v3016_v30 }
 0x424   : > { %4093 = vmatprep.subr.msk.mxu1 %vm378_vm5, %v3018_v4 }
 0x425   : > { %4094 = vmatpush1.msk.msra.mxu1 %vm378_vm5, %v3017_v31 }
 0x426   : > { %v3200_v27 = vpop.permute.xlu0 %3199  ;;  %v3105_v34 = vpop.permute.xlu1 %3104  ;;  %4095 = vmatmul.mubr.msk.f32.vlgmr.msra.gmra.mxu1 %vm374_vm13, %v4092_v42 }
 0x427   : > { %3274 = vmatprep.mubr.f32.mxu1 %v4278_v1 }
 0x42a   : > { %v3293_v35 = vpop.permute.xlu0 %3292  ;;  %v3196_v37 = vpop.permute.xlu1 %3195 }
 0x42e   : > { %v3572_v38 = vpop.permute.xlu0 %3571  ;;  %v3297_v39 = vpop.permute.xlu1 %3296 }
 0x432   : > { %v3103_v40 = vpop.permute.xlu0 %3102  ;;  %v3475_v43 = vpop.permute.xlu1 %3474 }
 0x433   : > { %v3106_v44 = vsel %vm463_vm12, %v3101_v29, %v3103_v40  ;;  %v3107_v45 = vsel %vm463_vm12, %v3103_v40, %v3105_v34 }
 0x434   : > { %4096 = vmatprep.subr.msk.mxu0 %vm378_vm5, %v3107_v45 }
 0x435   : > { %4097 = vmatpush1.msk.msra.mxu0 %vm378_vm5, %v3106_v44 }
 0x436   : > { %v3295_v47 = vpop.permute.xlu0 %3294  ;;  %v3669_v48 = vpop.permute.xlu1 %3668  ;;  %4098 = vmatmul.mubr.msk.f32.vlgmr.msra.gmra.mxu0 %vm374_vm13, %v3005_v46 }
 0x437   : > { %v3298_v50 = vsel %vm674_vm10, %v3293_v35, %v3295_v47  ;;  %v3299_v55 = vsel %vm674_vm10, %v3295_v47, %v3297_v39  ;;  %3371 = vmatprep.mubr.f32.mxu0 %v4278_v1  ;;  %v3673_v9 = vsel %vm1061_vm9, %v3669_v48, %v3671_v51 }
 0x438   : > { %4104 = vmatprep.subr.msk.mxu0 %vm378_vm5, %v3299_v55 }
 0x439   : > { %4105 = vmatpush1.msk.msra.mxu0 %vm378_vm5, %v3298_v50 }
 0x43a   : > { %v3574_v49 = vpop.permute.xlu0 %3573  ;;  %v3198_v59 = vpop.permute.xlu1 %3197  ;;  %4106 = vmatmul.mubr.msk.f32.vlgmr.msra.gmra.mxu0 %vm374_vm13, %v4103_v56 }
 0x43b   : > { %v3201_v7 = vsel %vm569_vm11, %v3196_v37, %v3198_v59  ;;  %v3202_v52 = vsel %vm569_vm11, %v3198_v59, %v3200_v27  ;;  %3553 = vmatprep.mubr.f32.mxu0 %v4278_v1  ;;  %v3578_v2 = vsel %vm552_vm8, %v3574_v49, %v3576_v25 }
 0x43c   : > { %4100 = vmatprep.subr.msk.mxu1 %vm378_vm5, %v3202_v52 }
 0x43d   : > { %4101 = vmatpush1.msk.msra.mxu1 %vm378_vm5, %v3201_v7 }
 0x43e   : > { %4102 = vmatmul.mubr.msk.f32.vlgmr.msra.gmra.mxu1 %vm374_vm13, %v4099_v58  ;;  %4108 = vmatprep.subr.msk.mxu1 %vm378_vm5, %v4951_v21  ;;  %v3477_v60 = vpop.permute.xlu1 %3476  ;;  %v3766_v13 = vpop.permute.xlu0 %3765 }
 0x43f   : > { %v3480_v53 = vsel %vm657_vm7, %v3475_v43, %v3477_v60  ;;  %v3481_v0 = vsel %vm657_vm7, %v3477_v60, %v3479_v24  ;;  %4109 = vmatpush1.msk.msra.mxu1 %vm378_vm5, %v4926_v54  ;;  %3456 = vmatprep.mubr.f32.mxu1 %v4278_v1  ;;  %v3577_v54 = vsel %vm552_vm8, %v3572_v38, %v3574_v49 }
 0x440   : > { %4112 = vmatprep.subr.msk.mxu0 %vm378_vm5, %v3481_v0  ;;  %4116 = vmatprep.subr.msk.mxu1 %vm378_vm5, %v3578_v2 }
 0x441   : > { %4113 = vmatpush1.msk.msra.mxu0 %vm378_vm5, %v3480_v53 }
 0x442   : > { %4110 = vmatmul.mubr.msk.f32.vlgmr.msra.gmra.mxu1 %vm374_vm13, %v4107_v14  ;;  %4120 = vmatprep.subr.msk.mxu0 %vm378_vm5, %v3673_v9  ;;  %v3667_v15 = vpop.permute.xlu1 %3666  ;;  %v3764_v26 = vpop.permute.xlu0 %3763 }
 0x443   : > { %4117 = vmatpush1.msk.msra.mxu1 %vm378_vm5, %v3577_v54  ;;  %v3672_v17 = vsel %vm1061_vm9, %v3667_v15, %v3669_v48  ;;  %4114 = vmatmul.mubr.msk.f32.vlgmr.msra.gmra.mxu0 %vm374_vm13, %v4111_v16  ;;  %v3769_v21 = vsel %vm353_vm6, %v3764_v26, %v3766_v13 }
 0x444   : > { %4121 = vmatpush1.msk.msra.mxu0 %vm378_vm5, %v3672_v17  ;;  %3650 = vmatprep.mubr.f32.mxu1 %v4278_v1 }
 0x445   : > { %3745 = vmatprep.mubr.f32.mxu0 %v4278_v1 }
 0x446   : > { %4118 = vmatmul.mubr.msk.f32.vlgmr.msra.gmra.mxu1 %vm374_vm13, %v4115_v19  ;;  %v3768_v33 = vpop.permute.xlu1 %3767 }
 0x447   : > { %v3770_v63 = vsel %vm353_vm6, %v3766_v13, %v3768_v33  ;;  %4122 = vmatmul.mubr.msk.f32.vlgmr.msra.gmra.mxu0 %vm374_vm13, %v4119_v57  ;;  %3842 = vmatprep.mubr.f32.mxu1 %v4278_v1 }
 0x448   : > { %4124 = vmatprep.subr.msk.mxu1 %vm378_vm5, %v3770_v63 }
 0x449   : > { %4125 = vmatpush1.msk.msra.mxu1 %vm378_vm5, %v3769_v21 }
 0x44a   : > { %4126 = vmatmul.mubr.msk.f32.vlgmr.msra.gmra.mxu1 %vm374_vm13, %v4123_v62 }
 0x44f   : > { %v3860_v50 = vpop.permute.xlu0 %3859 }
 0x453   : > { %v3854_v43 = vpop.permute.xlu1 %3853 }
 0x4e6   : > { %v3092_v6 = vpop.f32.mrf.mxu1 }
 0x4e8   : > { %v3094_v3 = vpop.f32.mrf.mxu1 }
 0x4f6   : > { %v3181_v28 = vpop.f32.mrf.mxu0 }
 0x4f7   : > { %v3182_v22 = vadd.f32 %v3181_v28, %v3092_v6 }
 0x4f8   : > { %v3183_v20 = vpop.f32.mrf.mxu0 }
 0x4f9   : > { %v3184_v1 = vadd.f32 %v3183_v20, %v3094_v3 }
 0x4fa   : > { %v3373_v5 = vpop.f32.mrf.mxu0 }
 0x4fc   : > { %v3375_v12 = vpop.f32.mrf.mxu0 }
 0x4fe   : > { %v3276_v41 = vpop.f32.mrf.mxu1 }
 0x4ff   : > { %v3281_v36 = vadd.f32 %v3276_v41, %v3182_v22 }
 0x500   : > { %v3278_v11 = vpop.f32.mrf.mxu1 }
 0x501   : > { %v3282_v24 = vadd.f32 %v3278_v11, %v3184_v1  ;;  %v3378_v51 = vadd.f32 %v3373_v5, %v3281_v36 }
 0x502   : > { %v3458_v25 = vpop.f32.mrf.mxu1 }
 0x503   : > { %v3379_v30 = vadd.f32 %v3375_v12, %v3282_v24  ;;  %v3463_v61 = vadd.f32 %v3458_v25, %v3378_v51  ;;  %v3555_v29 = vpop.f32.mrf.mxu0 }
 0x504   : > { %v3460_v8 = vpop.f32.mrf.mxu1 }
 0x505   : > { %v3464_v31 = vadd.f32 %v3460_v8, %v3379_v30  ;;  %v3560_v4 = vadd.f32 %v3555_v29, %v3463_v61  ;;  %v3557_v42 = vpop.f32.mrf.mxu0 }
 0x506   : > { %v3652_v27 = vpop.f32.mrf.mxu1 }
 0x507   : > { %v3561_v34 = vadd.f32 %v3557_v42, %v3464_v31  ;;  %v3657_v35 = vadd.f32 %v3652_v27, %v3560_v4  ;;  %v3747_v37 = vpop.f32.mrf.mxu0 }
 0x508   : > { %v3654_v38 = vpop.f32.mrf.mxu1 }
 0x509   : > { %v3658_v39 = vadd.f32 %v3654_v38, %v3561_v34  ;;  %v3752_v40 = vadd.f32 %v3747_v37, %v3657_v35  ;;  %v3749_v44 = vpop.f32.mrf.mxu0 }
 0x50a   : > { %v3844_v45 = vpop.f32.mrf.mxu1 }
 0x50b   : > { %v3753_v46 = vadd.f32 %v3749_v44, %v3658_v39  ;;  %v3849_v47 = vadd.f32 %v3844_v45, %v3752_v40 }
 0x50c   : > { %v3846_v48 = vpop.f32.mrf.mxu1 }
 0x50d   : > { %v3850_v55 = vadd.f32 %v3846_v48, %v3753_v46  ;;  %v3856_v56 = vmul.f32 %v3854_v43, %v3849_v47 }
 0x50f   : > { %v3857_v49 = vmul.f32 %v3854_v43, %v3850_v55  ;;  %v3862_v59 = vadd.f32 %v3860_v50, %v3856_v56 }
 0x511   : > { %v3863_v7 = vadd.f32 %v3860_v50, %v3857_v49  ;;  %v4127_v52 = vmul.f32 -1.442695, %v3862_v59 }
 0x513   : > { %4206 = vpow2.f32 %v4127_v52  ;;  %v4128_v58 = vmul.f32 -1.442695, %v3863_v7 }
 0x515   : > { %4208 = vpow2.f32 %v4128_v58 }
 0x520   : > { %v4207_v60 = vpop.eup %4206 }
 0x521   : > { %v3870_v2 = vadd.f32 1.0, %v4207_v60 }
 0x522   : > { %v4209_v13 = vpop.eup %4208 }
 0x523   : > { %v3871_v53 = vadd.f32 1.0, %v4209_v13  ;;  %4210 = vrcp.f32 %v3870_v2 }
 0x525   : > { %4212 = vrcp.f32 %v3871_v53 }
 0x530   : > { %v4211_v0 = vpop.eup %4210 }
 0x531   : > { %v3876_v14 = vmul.f32 %v4211_v0, %v4788_v23 }
 0x532   : > { %v4213_v16 = vpop.eup %4212 }
 0x533   : > { %v3877_v9 = vmul.f32 %v4213_v16, %v4790_v32  ;;  %v3881_v54 = vadd.f32 %v3876_v14, %v4401_v10 }
 0x535   : > { %v3882_v15 = vadd.f32 %v3877_v9, %v4423_v18 }
 0x537   : > { %v3885_v17 = vcombine.low %v3881_v54, %v3882_v15 }
 0x539   : > { %3887 = vst [vmem:[%s286_s20] sm:$0xff] %v3885_v17 }
 0x53a   : > { %4229 = shalt.err (!%p4226_p3)
}
 0x53b   : > { %s4230_s21 = scalar_lea.hbm %s3901_s18, 128  ;;  %s4234_s14 = scalar_lea.hbm %s5094_s7, 256 }
 0x53c   : > { %p4231_p4 = scmp.ne.s32.totalorder %s3901_s18, %s4230_s21  ;;  %p4235_p9 = scmp.lt.s32.totalorder %s3901_s18, %s5094_s7 }
 0x53d   : > { %p4236_p10 = scmp.lt.s32.totalorder %s4234_s14, %s4230_s21 }
 0x53e   : > { %p4232_p7 = pnand %p4231_p4, %p4373_p5 }
 0x53f   : > { %p4237_p11 = por %p4236_p10, %p4235_p9 }
 0x540   : > { %p4233_p8 = pneg %p4232_p7 }
 0x542   : > { %p4238_p12 = pnand %p4237_p11, %p4233_p8 }
 0x544   : > { %4241 = shalt.err (!%p4238_p12)
}
 0x545   : > { %4137 = dma.vmem_to_hbm [thread:$0]  (%p4373_p5), %s3904_s15, 128, %s3901_s18, %s3889_s29  }
 0x546 PF: > { %p4143_p13 = scmp.ge.s32.totalorder %s4276_s27, 2  ;;  %s3915_s16 = sand.u32 1, %s4264_s24  }
 0x547   : > { %s3916_s17 = scalar_lea.sflag [#allocation5], %s3915_s16 }
 0x548   : > { %p4140_p0 = pnand %p4143_p13, %p4377_p6 }
 0x54a   : > { %p4141_p1 = pneg %p4140_p0 }
 0x54c   : > { %4259 = dma.done.wait (%p4141_p1), %s3916_s17, 128  }
 0x54d   : > { %4261 = vsyncadd (%p4141_p1), %s3916_s17, 4294967168  ;;  %p17_p2 = scmp.ge.s32.totalorder %s4360_s30, 4   ;;  %s5097_s24 = smov %s4268_s25 }
 0x54e   : > { %s5098_s25 = smov %s4272_s26  ;;  %s5099_s26 = smov %s4371_s10 }
 0x54f   : > { %s5100_s27 = smov %s4360_s30  ;;  %19 = sbr.rel (!%p17_p2) target bundleno = 3 (0x3), region = 118 }
 0x554   :  { %3921 = vsyncpa [#allocation5], 1 }
 0x555   :  { %3923 = vsyncpa [#allocation5 + $0x1], 1 }

</bundles_post_ra>
